<compile_context>
chip_gen: v7x
topology: tpu7x:2x2x1
jax: 0.10.0
libtpu: 0.0.40
codegen_flags: <defaults>
</compile_context>

<pallas_src>
import jax
import jax.numpy as jnp
from jax.experimental import pallas as pl
from jax.experimental.pallas import tpu as pltpu


def _round_up(x, m):
    return ((x + m - 1) // m) * m


def _unit_sgn_kernel(x_ref, w_ref, a_ref, scale_ref, shift_ref, o_ref):
    # x_ref:     (TM, V, Cin)      channels-last row block (rows = flattened (n, t))
    # w_ref:     (Cin, 2*Cp)       [conv | residual] 1x1 weights, concatenated, compute dtype
    # a_ref:     (V, V)            adjacency, compute dtype
    # scale_ref: (1, Cp) f32       BN scale  (gamma / sqrt(var + eps))
    # shift_ref: (1, Cp) f32       BN shift + folded residual bias
    # o_ref:     (TM, V, Cp)       lane-dense output block (Cp is a multiple of 128)
    tm, v, cin = x_ref.shape
    cp = o_ref.shape[-1]

    # (1) channel mix for conv + residual paths in a single MXU pass, f32 accumulation.
    x2 = x_ref[...].reshape(tm * v, cin)                       # leading-dim collapse only
    y = jnp.dot(x2, w_ref[...], preferred_element_type=jnp.float32)   # (TM*V, 2*Cp)
    y = y.reshape(tm, v, 2 * cp)
    y_conv = y[..., :cp]                                       # lane-tile-aligned split
    y_res = y[..., cp:]

    # (2) adjacency contraction over joints: z[m,u,o] = sum_v A[u,v] * y_conv[m,v,o]
    #     expressed as a batched matmul over the TM rows (flash-attention-style einsum).
    a_b = jnp.broadcast_to(a_ref[...][None], (tm, v, v))
    z = jnp.einsum("muv,mvo->muo", a_b, y_conv.astype(a_ref.dtype),
                   preferred_element_type=jnp.float32)

    # (3) f32 epilogue: BN scale/shift (+ residual bias already folded into shift) + ReLU.
    scale = scale_ref[...].reshape(1, 1, cp)
    shift = shift_ref[...].reshape(1, 1, cp)
    out = jnp.maximum((z + y_res) * scale + shift, 0.0)
    o_ref[...] = out.astype(o_ref.dtype)


def unit_sgn_forward(x_nchw, A, w_conv, w_res, b_res, gamma, beta,
                     run_mean, run_var, eps=1e-5, tm=512,
                     compute_dtype=jnp.bfloat16, out_dtype=jnp.float32):
    """x_nchw: (N, Cin, T, V), A: (V, V), w_conv/w_res: (Cout, Cin), b_res: (Cout,)."""
    N, Cin, T, V = x_nchw.shape
    Cout = w_conv.shape[0]
    f32 = jnp.float32

    # ---- BN (inference) + residual-bias fold into an f32 epilogue scale/shift ----
    scale = (gamma / jnp.sqrt(run_var + eps)).astype(f32)                 # (Cout,)
    shift = (beta - run_mean * scale + b_res.astype(f32) * scale)         # (Cout,)

    # ---- pad output channels to a lane-dense multiple of 128 ----
    Cp = _round_up(Cout, 128)
    wc = jnp.pad(jnp.transpose(w_conv).astype(f32), ((0, 0), (0, Cp - Cout)))  # (Cin, Cp)
    wr = jnp.pad(jnp.transpose(w_res).astype(f32), ((0, 0), (0, Cp - Cout)))   # (Cin, Cp)
    w_cat = jnp.concatenate([wc, wr], axis=1).astype(compute_dtype)            # (Cin, 2*Cp)
    scale_row = jnp.pad(scale, (0, Cp - Cout)).reshape(1, Cp).astype(f32)
    shift_row = jnp.pad(shift, (0, Cp - Cout)).reshape(1, Cp).astype(f32)
    a_mat = A.astype(compute_dtype)

    # ---- channels-last rows: (N, Cin, T, V) -> (rows, V, Cin), rows = N*T ----
    rows = N * T
    x_cl = jnp.transpose(x_nchw, (0, 2, 3, 1)).reshape(rows, V, Cin)

    # Row tile: large to amortize per-step overhead (sweep per generation; reduce on v7x).
    tm = max(8, min(tm, _round_up(rows, 8)))
    rows_p = _round_up(rows, tm)
    if rows_p != rows:
        x_cl = jnp.pad(x_cl, ((0, rows_p - rows), (0, 0), (0, 0)))
    x_cl = x_cl.astype(compute_dtype)

    grid = (rows_p // tm,)
    isz = jnp.dtype(compute_dtype).itemsize
    osz = jnp.dtype(out_dtype).itemsize
    cost = pl.CostEstimate(
        flops=2 * rows_p * V * Cin * (2 * Cp) + 2 * rows_p * V * V * Cp,
        transcendentals=0,
        bytes_accessed=(rows_p * V * Cin * isz + Cin * 2 * Cp * isz
                        + V * V * isz + 2 * Cp * 4 + rows_p * V * Cp * osz),
    )

    out = pl.pallas_call(
        _unit_sgn_kernel,
        out_shape=jax.ShapeDtypeStruct((rows_p, V, Cp), out_dtype),
        grid_spec=pltpu.PrefetchScalarGridSpec(
            num_scalar_prefetch=0,
            grid=grid,
            in_specs=[
                pl.BlockSpec((tm, V, Cin), lambda i: (i, 0, 0)),   # streamed x row blocks
                pl.BlockSpec((Cin, 2 * Cp), lambda i: (0, 0)),     # tiny fused conv|res weight
                pl.BlockSpec((V, V), lambda i: (0, 0)),            # adjacency
                pl.BlockSpec((1, Cp), lambda i: (0, 0)),           # BN scale (f32)
                pl.BlockSpec((1, Cp), lambda i: (0, 0)),           # BN shift (f32)
            ],
            out_specs=pl.BlockSpec((tm, V, Cp), lambda i: (i, 0, 0)),  # lane-dense output
        ),
        compiler_params=pltpu.CompilerParams(
            dimension_semantics=("parallel",),
            vmem_limit_bytes=64 * 1024 * 1024,
        ),
        cost_estimate=cost,
    )(x_cl, w_cat, a_mat, scale_row, shift_row)

    # back to NCHW: (rows_p, V, Cp) -> (N, Cout, T, V)
    out = out[:rows, :, :Cout].reshape(N, T, V, Cout)
    return jnp.transpose(out, (0, 3, 1, 2))


def _reference(x_nchw, A, w_conv, w_res, b_res, gamma, beta, run_mean, run_var, eps=1e-5):
    # pure-JAX reference mirroring the PyTorch forward (BN in eval mode)
    x1 = jnp.transpose(x_nchw, (0, 2, 3, 1))                    # (N, T, V, Cin)
    x1 = jnp.einsum("uv,ntvc->ntuc", A, x1)                     # A.matmul(x1)
    x1 = jnp.transpose(x1, (0, 3, 1, 2))                        # (N, Cin, T, V)
    conv = jnp.einsum("oc,nctv->notv", w_conv, x1)
    res = jnp.einsum("oc,nctv->notv", w_res, x_nchw) + b_res[None, :, None, None]
    y = conv + res
    y = (y - run_mean[None, :, None, None]) / jnp.sqrt(run_var[None, :, None, None] + eps)
    y = y * gamma[None, :, None, None] + beta[None, :, None, None]
    return jnp.maximum(y, 0.0)


if __name__ == "__main__":
    N, Cin, Cout, T, V = 2, 4, 8, 16, 16

    key = jax.random.PRNGKey(0)
    kx, ka, kwc, kwr, kg, kb, km, kv = jax.random.split(key, 8)

    x = jax.random.normal(kx, (N, Cin, T, V), dtype=jnp.float32)
    A = jax.random.normal(ka, (V, V), dtype=jnp.float32) * 0.1

    # deterministic synthetic parameters (shapes follow the module __init__)
    w_conv = jax.random.normal(kwc, (Cout, Cin), dtype=jnp.float32) * 0.5   # conv 1x1, bias=False
    w_res = jax.random.normal(kwr, (Cout, Cin), dtype=jnp.float32) * 0.5    # residual 1x1
    b_res = jnp.zeros((Cout,), dtype=jnp.float32)                           # bias=False default
    gamma = 1.0 + 0.1 * jax.random.normal(kg, (Cout,), dtype=jnp.float32)
    beta = 0.1 * jax.random.normal(kb, (Cout,), dtype=jnp.float32)
    run_mean = 0.1 * jax.random.normal(km, (Cout,), dtype=jnp.float32)
    run_var = jnp.abs(1.0 + 0.1 * jax.random.normal(kv, (Cout,), dtype=jnp.float32))

    ref = _reference(x, A, w_conv, w_res, b_res, gamma, beta, run_mean, run_var)

    # f32 compute / f32 output path: tight numerical check.
    out_f32 = unit_sgn_forward(x, A, w_conv, w_res, b_res, gamma, beta, run_mean, run_var,
                               compute_dtype=jnp.float32, out_dtype=jnp.float32)
    out_f32 = jax.block_until_ready(out_f32)
    assert out_f32.shape == (N, Cout, T, V)
    assert jnp.allclose(out_f32, ref, atol=1e-3, rtol=1e-3), "f32 mismatch vs reference"

    # Production config: bf16 operands + bf16 output, BN scale applied in the f32 epilogue.
    out_bf16 = unit_sgn_forward(x, A, w_conv, w_res, b_res, gamma, beta, run_mean, run_var,
                                compute_dtype=jnp.bfloat16, out_dtype=jnp.bfloat16)
    out_bf16 = jax.block_until_ready(out_bf16)
    assert out_bf16.shape == (N, Cout, T, V)
    assert jnp.allclose(out_bf16.astype(jnp.float32), ref, atol=1e-1, rtol=1e-1), \
        "bf16 mismatch vs reference"

    print("KERNEL_OK")
</pallas_src>

<mosaic_0001>
module attributes {stable_mosaic.version = 11 : i64} {
  func.func @_unit_sgn_kernel(%arg0: i32, %arg1: memref<32x16x4xf32, #tpu.memory_space<vmem>>, %arg2: memref<4x256xf32, #tpu.memory_space<vmem>>, %arg3: memref<16x16xf32, #tpu.memory_space<vmem>>, %arg4: memref<1x128xf32, #tpu.memory_space<vmem>>, %arg5: memref<1x128xf32, #tpu.memory_space<vmem>>, %arg6: memref<32x16x128xf32, #tpu.memory_space<vmem>>) attributes {dimension_semantics = [#tpu.dimension_semantics<parallel>], iteration_bounds = array<i64: 1>, scalar_prefetch = 0 : i64, scratch_operands = 0 : i64, tpu.core_type = #tpu.core_type<tc>, window_params = [{transform_indices = @transform_0, window_bounds = array<i64: 32, 16, 4>}, {pipeline_mode = #tpu.pipeline_mode<synchronous>, transform_indices = @transform_1, window_bounds = array<i64: 4, 256>}, {pipeline_mode = #tpu.pipeline_mode<synchronous>, transform_indices = @transform_2, window_bounds = array<i64: 16, 16>}, {pipeline_mode = #tpu.pipeline_mode<synchronous>, transform_indices = @transform_3, window_bounds = array<i64: 1, 128>}, {pipeline_mode = #tpu.pipeline_mode<synchronous>, transform_indices = @transform_4, window_bounds = array<i64: 1, 128>}, {transform_indices = @transform_5, window_bounds = array<i64: 32, 16, 128>}]} {
    %c0 = arith.constant 0 : index
    %c0_0 = arith.constant 0 : index
    %c0_1 = arith.constant 0 : index
    %0 = vector.load %arg1[%c0, %c0_0, %c0_1] : memref<32x16x4xf32, #tpu.memory_space<vmem>>, vector<32x16x4xf32>
    %1 = vector.shape_cast %0 : vector<32x16x4xf32> to vector<512x4xf32>
    %c0_2 = arith.constant 0 : index
    %c0_3 = arith.constant 0 : index
    %2 = vector.load %arg2[%c0_2, %c0_3] : memref<4x256xf32, #tpu.memory_space<vmem>>, vector<4x256xf32>
    %cst = arith.constant dense<0.000000e+00> : vector<512x256xf32>
    %3 = tpu.matmul %1, %2, %cst {dimension_numbers = #tpu.dot_dimension_numbers<[1], [0], [0], [1], [0, 0, 1, 1], [], []>} : vector<512x4xf32>, vector<4x256xf32>, vector<512x256xf32> -> vector<512x256xf32>
    %4 = vector.shape_cast %3 : vector<512x256xf32> to vector<32x16x256xf32>
    %5 = vector.extract_strided_slice %4 {offsets = [0, 0, 0], sizes = [32, 16, 128], strides = [1, 1, 1]} : vector<32x16x256xf32> to vector<32x16x128xf32>
    %6 = vector.extract_strided_slice %4 {offsets = [0, 0, 128], sizes = [32, 16, 128], strides = [1, 1, 1]} : vector<32x16x256xf32> to vector<32x16x128xf32>
    %c0_4 = arith.constant 0 : index
    %c0_5 = arith.constant 0 : index
    %7 = vector.load %arg3[%c0_4, %c0_5] : memref<16x16xf32, #tpu.memory_space<vmem>>, vector<16x16xf32>
    %8 = vector.shape_cast %7 : vector<16x16xf32> to vector<1x16x16xf32>
    %9 = vector.shape_cast %8 : vector<1x16x16xf32> to vector<1x16x16xf32>
    %10 = vector.broadcast %9 : vector<1x16x16xf32> to vector<32x16x16xf32>
    "tpu.trace_start"() <{level = 10 : i32, message = "muv,mvo->muo"}> : () -> ()
    %cst_6 = arith.constant dense<0.000000e+00> : vector<32x16x128xf32>
    %11 = tpu.matmul %10, %5, %cst_6 {dimension_numbers = #tpu.dot_dimension_numbers<[2], [1], [1], [2], [0, 0, 0, 1, 1, 2], [0], [0]>} : vector<32x16x16xf32>, vector<32x16x128xf32>, vector<32x16x128xf32> -> vector<32x16x128xf32>
    "tpu.trace_stop"() : () -> ()
    %c0_7 = arith.constant 0 : index
    %c0_8 = arith.constant 0 : index
    %12 = vector.load %arg4[%c0_7, %c0_8] : memref<1x128xf32, #tpu.memory_space<vmem>>, vector<1x128xf32>
    %13 = vector.shape_cast %12 : vector<1x128xf32> to vector<1x1x128xf32>
    %c0_9 = arith.constant 0 : index
    %c0_10 = arith.constant 0 : index
    %14 = vector.load %arg5[%c0_9, %c0_10] : memref<1x128xf32, #tpu.memory_space<vmem>>, vector<1x128xf32>
    %15 = vector.shape_cast %14 : vector<1x128xf32> to vector<1x1x128xf32>
    %16 = arith.addf %11, %6 : vector<32x16x128xf32>
    %17 = vector.broadcast %13 : vector<1x1x128xf32> to vector<32x16x128xf32>
    %18 = arith.mulf %16, %17 : vector<32x16x128xf32>
    %19 = vector.broadcast %15 : vector<1x1x128xf32> to vector<32x16x128xf32>
    %20 = arith.addf %18, %19 : vector<32x16x128xf32>
    %cst_11 = arith.constant 0.000000e+00 : f32
    %21 = vector.broadcast %cst_11 : f32 to vector<32x16x128xf32>
    %22 = arith.maximumf %20, %21 : vector<32x16x128xf32>
    %c0_12 = arith.constant 0 : index
    %c0_13 = arith.constant 0 : index
    %c0_14 = arith.constant 0 : index
    %23 = vector.load %arg6[%c0_12, %c0_13, %c0_14] : memref<32x16x128xf32, #tpu.memory_space<vmem>>, vector<32x16x128xf32>
    tpu.vector_store %arg6[%c0_12, %c0_13, %c0_14], %22 {strides = array<i32>} : memref<32x16x128xf32, #tpu.memory_space<vmem>>, vector<32x16x128xf32>,
    return
  }
  func.func @transform_0(%arg0: i32) -> (i32, i32, i32) {
    %c0_i32 = arith.constant 0 : i32
    %c0_i32_0 = arith.constant 0 : i32
    %c0_i32_1 = arith.constant 0 : i32
    return %arg0, %c0_i32, %c0_i32_0 : i32, i32, i32
  }
  func.func @transform_1(%arg0: i32) -> (i32, i32) {
    %c0_i32 = arith.constant 0 : i32
    %c0_i32_0 = arith.constant 0 : i32
    %c0_i32_1 = arith.constant 0 : i32
    return %c0_i32, %c0_i32_0 : i32, i32
  }
  func.func @transform_2(%arg0: i32) -> (i32, i32) {
    %c0_i32 = arith.constant 0 : i32
    %c0_i32_0 = arith.constant 0 : i32
    %c0_i32_1 = arith.constant 0 : i32
    return %c0_i32, %c0_i32_0 : i32, i32
  }
  func.func @transform_3(%arg0: i32) -> (i32, i32) {
    %c0_i32 = arith.constant 0 : i32
    %c0_i32_0 = arith.constant 0 : i32
    %c0_i32_1 = arith.constant 0 : i32
    return %c0_i32, %c0_i32_0 : i32, i32
  }
  func.func @transform_4(%arg0: i32) -> (i32, i32) {
    %c0_i32 = arith.constant 0 : i32
    %c0_i32_0 = arith.constant 0 : i32
    %c0_i32_1 = arith.constant 0 : i32
    return %c0_i32, %c0_i32_0 : i32, i32
  }
  func.func @transform_5(%arg0: i32) -> (i32, i32, i32) {
    %c0_i32 = arith.constant 0 : i32
    %c0_i32_0 = arith.constant 0 : i32
    %c0_i32_1 = arith.constant 0 : i32
    return %arg0, %c0_i32, %c0_i32_0 : i32, i32, i32
  }
}

</mosaic_0001>

<bundles_post_ra>
// kernel: tpu_custom_call.1
= control target key start
LH: loop header
LB: loop body
LE: loop exit
PB: predicated region body
PF: predicated region fallthrough
CT: control target
= control target key end

     0   :  { %10 = vsyncpa [#allocation3], 0  ;;  %s4995_s0 = inlined_call_operand.hbm [shape: f32[32,16,4], index: 0, kind: input, shape index: {}]   ;;  %s4996_s1 = inlined_call_operand.hbm [shape: f32[4,256], index: 1, kind: input, shape index: {}]   ;;  %s4997_s2 = inlined_call_operand.hbm [shape: f32[16,16], index: 2, kind: input, shape index: {}]   ;;  %s4998_s3 = inlined_call_operand.hbm [shape: f32[1,128], index: 3, kind: input, shape index: {}]   ;;  %s4999_s4 = inlined_call_operand.hbm [shape: f32[1,128], index: 4, kind: input, shape index: {}]   ;;  %s5000_s5 = inlined_call_operand.hbm [shape: f32[32,16,128], index: 5, kind: output, shape index: {}]  }
   0x1   :  { %11 = vsyncpa [#allocation6], 0 }
   0x2   :  { %12 = vsyncpa [#allocation9], 0 }
   0x3   :  { %13 = vsyncpa [#allocation4], 0  ;;  %s4259_s18 = smov [#allocation5]   ;;  %s4260_s20 = smov [#allocation8]  }
   0x4   :  { %s32_s19 = sshll.u32 %s4259_s18, 4  ;;  %s54_s21 = sshll.u32 %s4260_s20, 4  ;;  %s33_s19 = int_to_ptr.vmem [resolvable:$true] %s32_s19  ;;  %s55_s21 = int_to_ptr.vmem [resolvable:$true] %s54_s21 }
   0x5   :  { %s4119_s24 = scalar_lea.hbm %s4996_s1, 128 }
   0x6   :  { %p4120_p0 = scmp.ne.s32.totalorder %s4996_s1, %s4119_s24  ;;  %p4123_p1 = scmp.lt.u32.totalorder %s4119_s24, %s4996_s1 }
   0x8   :  { %p4125_p2 = pnand %p4123_p1, %p4120_p0 }
   0xa   :  { %4128 = shalt.err (!%p4125_p2)
}
   0xb   :  { %s4129_s29 = scalar_lea.vmem %s33_s19, 128  ;;  %p4134_p4 = scmp.lt.s32.totalorder %s33_s19, %s33_s19 }
   0xc   :  { %p4130_p3 = scmp.ne.s32.totalorder %s33_s19, %s4129_s29  ;;  %p4135_p5 = scmp.lt.s32.totalorder %s4129_s29, %s4129_s29 }
   0xe   :  { %p4136_p6 = por %p4135_p5, %p4134_p4 }
  0x10   :  { %p4137_p7 = pnand %p4136_p6, %p4130_p3 }
  0x12   :  { %4140 = shalt.err (!%p4137_p7)
}
  0x13   :  { %35 = dma.hbm_to_vmem [thread:$0]  %s4996_s1, 128, %s33_s19, [#allocation6]  }
  0x14   :  { %s4141_s9 = scalar_lea.hbm %s4998_s3, 16 }
  0x15   :  { %p4142_p8 = scmp.ne.s32.totalorder %s4998_s3, %s4141_s9  ;;  %p4145_p9 = scmp.lt.u32.totalorder %s4141_s9, %s4998_s3 }
  0x17   :  { %p4147_p10 = pnand %p4145_p9, %p4142_p8 }
  0x19   :  { %4150 = shalt.err (!%p4147_p10)
}
  0x1a   :  { %s4151_s14 = scalar_lea.vmem %s55_s21, 16  ;;  %s4155_s15 = scalar_lea.vmem %s55_s21, 32 }
  0x1b   :  { %p4152_p11 = scmp.ne.s32.totalorder %s55_s21, %s4151_s14  ;;  %p4156_p12 = scmp.lt.s32.totalorder %s55_s21, %s55_s21 }
  0x1c   :  { %p4157_p13 = scmp.lt.s32.totalorder %s4155_s15, %s4151_s14 }
  0x1e   :  { %p4158_p0 = por %p4157_p13, %p4156_p12 }
  0x20   :  { %p4159_p1 = pnand %p4158_p0, %p4152_p11 }
  0x22   :  { %4162 = shalt.err (!%p4159_p1)
}
  0x23   :  { %57 = dma.hbm_to_vmem [thread:$0]  %s4998_s3, 16, %s55_s21, [#allocation9]  }
  0x24   :  { %s4261_s17 = smov [#allocation2]   ;;  %s4163_s22 = scalar_lea.hbm %s4995_s0, 8192 }
  0x25   :  { %s19_s18 = sshll.u32 %s4261_s17, 4  ;;  %p4164_p2 = scmp.ne.s32.totalorder %s4995_s0, %s4163_s22  ;;  %s20_s18 = int_to_ptr.vmem [resolvable:$true] %s19_s18 }
  0x26   :  { %p4167_p3 = scmp.lt.u32.totalorder %s4163_s22, %s4995_s0 }
  0x28   :  { %p4169_p4 = pnand %p4167_p3, %p4164_p2 }
  0x2a   :  { %4172 = shalt.err (!%p4169_p4)
}
  0x2b   :  { %s4173_s27 = scalar_lea.vmem %s20_s18, 8192  ;;  %p4178_p6 = scmp.lt.s32.totalorder %s20_s18, %s20_s18 }
  0x2c   :  { %p4174_p5 = scmp.ne.s32.totalorder %s20_s18, %s4173_s27  ;;  %p4179_p7 = scmp.lt.s32.totalorder %s4173_s27, %s4173_s27 }
  0x2e   :  { %p4180_p8 = por %p4179_p7, %p4178_p6 }
  0x30   :  { %p4181_p9 = pnand %p4180_p8, %p4174_p5 }
  0x32   :  { %4184 = shalt.err (!%p4181_p9)
}
  0x33   :  { %s4262_s3 = smov 128   ;;  %s4263_s21 = smov 8  }
  0x34   :  { %25 = dma.hbm_to_vmem [thread:$0]  %s4995_s0, 8192, %s20_s18, [#allocation3], %s4262_s3, %s4262_s3, %s4263_s21  }
  0x35   :  { %s4264_s30 = smov [#allocation7]   ;;  %s4265_s7 = smov [#allocation10]  }
  0x36   :  { %s41_s6 = sshll.u32 %s4264_s30, 4  ;;  %s64_s8 = sshll.u32 %s4265_s7, 4  ;;  %s42_s6 = int_to_ptr.vmem [resolvable:$true] %s41_s6  ;;  %s65_s8 = int_to_ptr.vmem [resolvable:$true] %s64_s8 }
  0x37   :  { %s4185_s11 = scalar_lea.hbm %s4997_s2, 256 }
  0x38   :  { %p4186_p10 = scmp.ne.s32.totalorder %s4997_s2, %s4185_s11  ;;  %p4189_p11 = scmp.lt.u32.totalorder %s4185_s11, %s4997_s2 }
  0x3a   :  { %p4191_p12 = pnand %p4189_p11, %p4186_p10 }
  0x3c   :  { %4194 = shalt.err (!%p4191_p12)
}
  0x3d   :  { %s4195_s0 = scalar_lea.vmem %s42_s6, 256  ;;  %p4200_p0 = scmp.lt.s32.totalorder %s42_s6, %s42_s6 }
  0x3e   :  { %p4196_p13 = scmp.ne.s32.totalorder %s42_s6, %s4195_s0  ;;  %p4201_p1 = scmp.lt.s32.totalorder %s4195_s0, %s4195_s0 }
  0x40   :  { %p4202_p2 = por %p4201_p1, %p4200_p0 }
  0x42   :  { %p4203_p3 = pnand %p4202_p2, %p4196_p13 }
  0x44   :  { %4206 = shalt.err (!%p4203_p3)
}
  0x45   :  { %47 = dma.hbm_to_vmem [thread:$0]  %s4997_s2, 256, %s42_s6, [#allocation6], %s4262_s3, %s4262_s3, %s4263_s21  }
  0x46   :  { %s4207_s19 = scalar_lea.hbm %s4999_s4, 16 }
  0x47   :  { %p4208_p4 = scmp.ne.s32.totalorder %s4999_s4, %s4207_s19  ;;  %p4211_p5 = scmp.lt.u32.totalorder %s4207_s19, %s4999_s4 }
  0x49   :  { %p4213_p6 = pnand %p4211_p5, %p4208_p4 }
  0x4b   :  { %4216 = shalt.err (!%p4213_p6)
}
  0x4c   :  { %s4217_s25 = scalar_lea.vmem %s65_s8, 16  ;;  %s4221_s26 = scalar_lea.vmem %s65_s8, 32 }
  0x4d   :  { %p4218_p7 = scmp.ne.s32.totalorder %s65_s8, %s4217_s25  ;;  %p4222_p8 = scmp.lt.s32.totalorder %s65_s8, %s65_s8 }
  0x4e   :  { %p4223_p9 = scmp.lt.s32.totalorder %s4221_s26, %s4217_s25 }
  0x50   :  { %p4224_p10 = por %p4223_p9, %p4222_p8 }
  0x52   :  { %p4225_p11 = pnand %p4224_p10, %p4218_p7 }
  0x54   :  { %4228 = shalt.err (!%p4225_p11)
}
  0x55   :  { %67 = dma.hbm_to_vmem [thread:$0]  %s4999_s4, 16, %s65_s8, [#allocation9]  }
  0x56   :  { %4251 = dma.done.wait [#allocation3], 8192  }
  0x57   :  { %4252 = vsyncadd [#allocation3], 4294959104 }
  0x58   :  { %4253 = dma.done.wait [#allocation6], 384  }
  0x59   :  { %4254 = vsyncadd [#allocation6], 4294966912 }
  0x5a   :  { %4255 = dma.done.wait [#allocation9], 32  }
  0x5b   :  { %4256 = vsyncadd [#allocation9], 4294967264  ;;  %v4266_v0 = vmov 0.0   ;;  %v147_v1 = vld [vmem:[#allocation5] sm:$0xff]  ;;  %vm343_vm0 = vcmask 1043456   ;;  %vm150_vm1 = vcmask 31744  }
  0x5c   :  { %412 = vmatprep.mubr.f32.mxu0 %v4266_v0  ;;  %700 = vmatprep.mubr.f32.mxu1 %v4266_v0  ;;  %v149_v2 = vcombine.high %v147_v1, %v147_v1  ;;  %v83_v3 = vld [vmem:[#allocation2] sm:$0xff]  ;;  %v84_v4 = vld [vmem:[#allocation2 + $0x8] sm:$0xff]  ;;  %v85_v5 = vld [vmem:[#allocation2 + $0x10] sm:$0xff]  ;;  %vm801_vm2 = vcmask 130048   ;;  %s4267_s4 = smov [#allocation11]  }
  0x5d   :  { %v86_v6 = vld [vmem:[#allocation2 + $0x18] sm:$0xff]  ;;  %v87_v7 = vld [vmem:[#allocation2 + $0x20] sm:$0xff]  ;;  %v88_v8 = vld [vmem:[#allocation2 + $0x28] sm:$0xff]  ;;  %s3481_s28 = sshll.u32 %s4267_s4, 4  ;;  %s3482_s28 = int_to_ptr.vmem [resolvable:$true] %s3481_s28 }
  0x5e   :  { %3495 = vmatprep.subr.msk.mxu0 %vm343_vm0, %v149_v2  ;;  %4107 = vmatprep.subr.msk.mxu1 %vm343_vm0, %v149_v2  ;;  %v89_v9 = vld [vmem:[#allocation2 + $0x30] sm:$0xff]  ;;  %v90_v10 = vld [vmem:[#allocation2 + $0x38] sm:$0xff]  ;;  %v131_v11 = vld [vmem:[#allocation2 + $0x180] sm:$0xff]  ;;  %s4229_s29 = scalar_lea.vmem %s3482_s28, 8192  ;;  %p4234_p13 = scmp.lt.s32.totalorder %s3482_s28, %s3482_s28 }
  0x5f   :  { %3496 = vmatpush1.msk.msra.mxu0 %vm343_vm0, %v147_v1  ;;  %4108 = vmatpush1.msk.msra.mxu1 %vm343_vm0, %v147_v1  ;;  %v91_v12 = vld [vmem:[#allocation2 + $0x40] sm:$0xff]  ;;  %v132_v13 = vld [vmem:[#allocation2 + $0x188] sm:$0xff]  ;;  %v133_v15 = vld [vmem:[#allocation2 + $0x190] sm:$0xff]  ;;  %p4230_p12 = scmp.ne.s32.totalorder %s3482_s28, %s4229_s29  ;;  %p4235_p0 = scmp.lt.s32.totalorder %s4229_s29, %s4229_s29 }
  0x60   :  { %3497 = vmatmul.mubr.msk.f32.vlgmr.msra.gmra.mrb[0].mxu0 %vm150_vm1, %v83_v3  ;;  %3545 = vmatmul.mubr.msk.f32.vlgmr.msra.gmra.mrb[0].mxu1 %vm150_vm1, %v131_v11  ;;  %v92_v14 = vld [vmem:[#allocation2 + $0x48] sm:$0xff]  ;;  %v93_v16 = vld [vmem:[#allocation2 + $0x50] sm:$0xff]  ;;  %v134_v17 = vld [vmem:[#allocation2 + $0x198] sm:$0xff] }
  0x61   :  { %418 = vmatprep.mubr.f32.mxu0 %v4266_v0  ;;  %706 = vmatprep.mubr.f32.mxu1 %v4266_v0  ;;  %v94_v18 = vld [vmem:[#allocation2 + $0x58] sm:$0xff]  ;;  %v135_v19 = vld [vmem:[#allocation2 + $0x1a0] sm:$0xff]  ;;  %v136_v21 = vld [vmem:[#allocation2 + $0x1a8] sm:$0xff]  ;;  %p4236_p1 = por %p4235_p0, %p4234_p13 }
  0x62   :  { %v95_v20 = vld [vmem:[#allocation2 + $0x60] sm:$0xff]  ;;  %v96_v22 = vld [vmem:[#allocation2 + $0x68] sm:$0xff]  ;;  %v137_v23 = vld [vmem:[#allocation2 + $0x1b0] sm:$0xff] }
  0x63   :  { %v97_v24 = vld [vmem:[#allocation2 + $0x70] sm:$0xff]  ;;  %v138_v25 = vld [vmem:[#allocation2 + $0x1b8] sm:$0xff]  ;;  %v139_v27 = vld [vmem:[#allocation2 + $0x1c0] sm:$0xff]  ;;  %p4237_p2 = pnand %p4236_p1, %p4230_p12 }
  0x64   :  { %3498 = vmatmul.mubr.msk.f32.gmra.mrb[2].mxu0 %vm150_vm1, %v84_v4  ;;  %3546 = vmatmul.mubr.msk.f32.gmra.mrb[2].mxu1 %vm150_vm1, %v132_v13  ;;  %v98_v26 = vld [vmem:[#allocation2 + $0x78] sm:$0xff]  ;;  %v99_v28 = vld [vmem:[#allocation2 + $0x80] sm:$0xff]  ;;  %v140_v29 = vld [vmem:[#allocation2 + $0x1c8] sm:$0xff] }
  0x65   :  { %424 = vmatprep.mubr.f32.mxu0 %v4266_v0  ;;  %712 = vmatprep.mubr.f32.mxu1 %v4266_v0  ;;  %v100_v30 = vld [vmem:[#allocation2 + $0x88] sm:$0xff]  ;;  %v141_v31 = vld [vmem:[#allocation2 + $0x1d0] sm:$0xff]  ;;  %v142_v33 = vld [vmem:[#allocation2 + $0x1d8] sm:$0xff] }
  0x66   :  { %v101_v32 = vld [vmem:[#allocation2 + $0x90] sm:$0xff]  ;;  %v102_v34 = vld [vmem:[#allocation2 + $0x98] sm:$0xff]  ;;  %v143_v35 = vld [vmem:[#allocation2 + $0x1e0] sm:$0xff] }
  0x67   :  { %v103_v36 = vld [vmem:[#allocation2 + $0xa0] sm:$0xff]  ;;  %v144_v37 = vld [vmem:[#allocation2 + $0x1e8] sm:$0xff]  ;;  %v145_v39 = vld [vmem:[#allocation2 + $0x1f0] sm:$0xff] }
  0x68   :  { %3499 = vmatmul.mubr.msk.f32.gmra.mrb[4].mxu0 %vm150_vm1, %v85_v5  ;;  %3547 = vmatmul.mubr.msk.f32.gmra.mrb[4].mxu1 %vm150_vm1, %v133_v15  ;;  %v104_v38 = vld [vmem:[#allocation2 + $0xa8] sm:$0xff]  ;;  %v105_v40 = vld [vmem:[#allocation2 + $0xb0] sm:$0xff]  ;;  %v146_v41 = vld [vmem:[#allocation2 + $0x1f8] sm:$0xff] }
  0x69   :  { %430 = vmatprep.mubr.f32.mxu0 %v4266_v0  ;;  %718 = vmatprep.mubr.f32.mxu1 %v4266_v0  ;;  %v106_v42 = vld [vmem:[#allocation2 + $0xb8] sm:$0xff]  ;;  %v4444_v43 = vld [vmem:[#allocation7] sm:$0xff]  ;;  %v107_v44 = vld [vmem:[#allocation2 + $0xc0] sm:$0xff] }
  0x6a   :  { %v108_v45 = vld [vmem:[#allocation2 + $0xc8] sm:$0xff]  ;;  %v109_v46 = vld [vmem:[#allocation2 + $0xd0] sm:$0xff]  ;;  %v110_v47 = vld [vmem:[#allocation2 + $0xd8] sm:$0xff] }
  0x6b   :  { %v111_v48 = vld [vmem:[#allocation2 + $0xe0] sm:$0xff]  ;;  %v112_v49 = vld [vmem:[#allocation2 + $0xe8] sm:$0xff]  ;;  %v113_v50 = vld [vmem:[#allocation2 + $0xf0] sm:$0xff] }
  0x6c   :  { %3500 = vmatmul.mubr.msk.f32.gmra.mrb[6].mxu0 %vm150_vm1, %v86_v6  ;;  %3548 = vmatmul.mubr.msk.f32.gmra.mrb[6].mxu1 %vm150_vm1, %v134_v17  ;;  %v114_v51 = vld [vmem:[#allocation2 + $0xf8] sm:$0xff]  ;;  %v115_v52 = vld [vmem:[#allocation2 + $0x100] sm:$0xff]  ;;  %v116_v53 = vld [vmem:[#allocation2 + $0x108] sm:$0xff] }
  0x6d   :  { %436 = vmatprep.mubr.f32.mxu0 %v4266_v0  ;;  %724 = vmatprep.mubr.f32.mxu1 %v4266_v0  ;;  %v117_v54 = vld [vmem:[#allocation2 + $0x110] sm:$0xff]  ;;  %v118_v55 = vld [vmem:[#allocation2 + $0x118] sm:$0xff]  ;;  %v119_v56 = vld [vmem:[#allocation2 + $0x120] sm:$0xff] }
  0x6e   :  { %v120_v57 = vld [vmem:[#allocation2 + $0x128] sm:$0xff]  ;;  %v121_v58 = vld [vmem:[#allocation2 + $0x130] sm:$0xff]  ;;  %v122_v59 = vld [vmem:[#allocation2 + $0x138] sm:$0xff] }
  0x6f   :  { %v123_v60 = vld [vmem:[#allocation2 + $0x140] sm:$0xff]  ;;  %v124_v61 = vld [vmem:[#allocation2 + $0x148] sm:$0xff]  ;;  %v125_v62 = vld [vmem:[#allocation2 + $0x150] sm:$0xff] }
  0x70   :  { %3501 = vmatmul.mubr.msk.f32.gmra.mrb[8].mxu0 %vm150_vm1, %v87_v7  ;;  %3549 = vmatmul.mubr.msk.f32.gmra.mrb[8].mxu1 %vm150_vm1, %v135_v19  ;;  %v126_v63 = vld [vmem:[#allocation2 + $0x158] sm:$0xff]  ;;  %v127_v1 = vld [vmem:[#allocation2 + $0x160] sm:$0xff]  ;;  %v128_v2 = vld [vmem:[#allocation2 + $0x168] sm:$0xff] }
  0x71   :  { %442 = vmatprep.mubr.f32.mxu0 %v4266_v0  ;;  %730 = vmatprep.mubr.f32.mxu1 %v4266_v0  ;;  %v129_v3 = vld [vmem:[#allocation2 + $0x170] sm:$0xff]  ;;  %v130_v4 = vld [vmem:[#allocation2 + $0x178] sm:$0xff] }
  0x72   :  { %v4500_v11 = vld [vmem:[#allocation7 + $0x8] sm:$0xff] }
  0x74   :  { %3502 = vmatmul.mubr.msk.f32.gmra.mrb[10].mxu0 %vm150_vm1, %v88_v8  ;;  %3550 = vmatmul.mubr.msk.f32.gmra.mrb[10].mxu1 %vm150_vm1, %v136_v21 }
  0x75   :  { %448 = vmatprep.mubr.f32.mxu0 %v4266_v0  ;;  %736 = vmatprep.mubr.f32.mxu1 %v4266_v0 }
  0x78   :  { %3503 = vmatmul.mubr.msk.f32.gmra.mrb[12].mxu0 %vm150_vm1, %v89_v9  ;;  %3551 = vmatmul.mubr.msk.f32.gmra.mrb[12].mxu1 %vm150_vm1, %v137_v23 }
  0x79   :  { %454 = vmatprep.mubr.f32.mxu0 %v4266_v0  ;;  %742 = vmatprep.mubr.f32.mxu1 %v4266_v0 }
  0x7c   :  { %3504 = vmatmul.mubr.msk.f32.gmra.mrb[14].mxu0 %vm150_vm1, %v90_v10  ;;  %3552 = vmatmul.mubr.msk.f32.gmra.mrb[14].mxu1 %vm150_vm1, %v138_v25 }
  0x7d   :  { %460 = vmatprep.mubr.f32.mxu0 %v4266_v0  ;;  %748 = vmatprep.mubr.f32.mxu1 %v4266_v0 }
  0x80   :  { %3505 = vmatmul.mubr.msk.f32.gmra.mrb[16].mxu0 %vm150_vm1, %v91_v12  ;;  %3553 = vmatmul.mubr.msk.f32.gmra.mrb[16].mxu1 %vm150_vm1, %v139_v27 }
  0x81   :  { %466 = vmatprep.mubr.f32.mxu0 %v4266_v0  ;;  %754 = vmatprep.mubr.f32.mxu1 %v4266_v0 }
  0x84   :  { %3506 = vmatmul.mubr.msk.f32.gmra.mrb[18].mxu0 %vm150_vm1, %v92_v14  ;;  %3554 = vmatmul.mubr.msk.f32.gmra.mrb[18].mxu1 %vm150_vm1, %v140_v29 }
  0x85   :  { %472 = vmatprep.mubr.f32.mxu0 %v4266_v0  ;;  %760 = vmatprep.mubr.f32.mxu1 %v4266_v0 }
  0x88   :  { %3507 = vmatmul.mubr.msk.f32.gmra.mrb[20].mxu0 %vm150_vm1, %v93_v16  ;;  %3555 = vmatmul.mubr.msk.f32.gmra.mrb[20].mxu1 %vm150_vm1, %v141_v31 }
  0x89   :  { %478 = vmatprep.mubr.f32.mxu0 %v4266_v0  ;;  %766 = vmatprep.mubr.f32.mxu1 %v4266_v0 }
  0x8c   :  { %3508 = vmatmul.mubr.msk.f32.gmra.mrb[22].mxu0 %vm150_vm1, %v94_v18  ;;  %3556 = vmatmul.mubr.msk.f32.gmra.mrb[22].mxu1 %vm150_vm1, %v142_v33 }
  0x8d   :  { %484 = vmatprep.mubr.f32.mxu0 %v4266_v0  ;;  %772 = vmatprep.mubr.f32.mxu1 %v4266_v0 }
  0x90   :  { %3509 = vmatmul.mubr.msk.f32.gmra.mrb[24].mxu0 %vm150_vm1, %v95_v20  ;;  %3557 = vmatmul.mubr.msk.f32.gmra.mrb[24].mxu1 %vm150_vm1, %v143_v35 }
  0x91   :  { %490 = vmatprep.mubr.f32.mxu0 %v4266_v0  ;;  %778 = vmatprep.mubr.f32.mxu1 %v4266_v0 }
  0x94   :  { %3510 = vmatmul.mubr.msk.f32.gmra.mrb[26].mxu0 %vm150_vm1, %v96_v22  ;;  %3558 = vmatmul.mubr.msk.f32.gmra.mrb[26].mxu1 %vm150_vm1, %v144_v37 }
  0x95   :  { %496 = vmatprep.mubr.f32.mxu0 %v4266_v0  ;;  %784 = vmatprep.mubr.f32.mxu1 %v4266_v0 }
  0x98   :  { %3511 = vmatmul.mubr.msk.f32.gmra.mrb[28].mxu0 %vm150_vm1, %v97_v24  ;;  %3559 = vmatmul.mubr.msk.f32.gmra.mrb[28].mxu1 %vm150_vm1, %v145_v39 }
  0x99   :  { %502 = vmatprep.mubr.f32.mxu0 %v4266_v0  ;;  %790 = vmatprep.mubr.f32.mxu1 %v4266_v0 }
  0x9c   :  { %3512 = vmatmul.mubr.msk.f32.gmra.mrb[30].mxu0 %vm150_vm1, %v98_v26  ;;  %3560 = vmatmul.mubr.msk.f32.gmra.mrb[30].mxu1 %vm150_vm1, %v146_v41 }
  0x9d   :  { %508 = vmatprep.mubr.f32.mxu0 %v4266_v0  ;;  %3759 = vmatprep.mubr.msk.f32.mxu1 %vm801_vm2, %v4444_v43 }
  0xa0   :  { %3513 = vmatmul.mubr.msk.f32.gmra.mrb[32].mxu0 %vm150_vm1, %v99_v28 }
  0xa1   :  { %514 = vmatprep.mubr.f32.mxu0 %v4266_v0 }
  0xa4   :  { %3514 = vmatmul.mubr.msk.f32.gmra.mrb[34].mxu0 %vm150_vm1, %v100_v30 }
  0xa5   :  { %520 = vmatprep.mubr.f32.mxu0 %v4266_v0 }
  0xa8   :  { %3515 = vmatmul.mubr.msk.f32.gmra.mrb[36].mxu0 %vm150_vm1, %v101_v32 }
  0xa9   :  { %526 = vmatprep.mubr.f32.mxu0 %v4266_v0 }
  0xac   :  { %3516 = vmatmul.mubr.msk.f32.gmra.mrb[38].mxu0 %vm150_vm1, %v102_v34 }
  0xad   :  { %532 = vmatprep.mubr.f32.mxu0 %v4266_v0 }
  0xb0   :  { %3517 = vmatmul.mubr.msk.f32.gmra.mrb[40].mxu0 %vm150_vm1, %v103_v36 }
  0xb1   :  { %538 = vmatprep.mubr.f32.mxu0 %v4266_v0 }
  0xb4   :  { %3518 = vmatmul.mubr.msk.f32.gmra.mrb[42].mxu0 %vm150_vm1, %v104_v38 }
  0xb5   :  { %544 = vmatprep.mubr.f32.mxu0 %v4266_v0 }
  0xb8   :  { %3519 = vmatmul.mubr.msk.f32.gmra.mrb[44].mxu0 %vm150_vm1, %v105_v40 }
  0xb9   :  { %550 = vmatprep.mubr.f32.mxu0 %v4266_v0 }
  0xbc   :  { %3520 = vmatmul.mubr.msk.f32.gmra.mrb[46].mxu0 %vm150_vm1, %v106_v42 }
  0xbd   :  { %556 = vmatprep.mubr.f32.mxu0 %v4266_v0 }
  0xc0   :  { %3521 = vmatmul.mubr.msk.f32.gmra.mrb[48].mxu0 %vm150_vm1, %v107_v44 }
  0xc1   :  { %562 = vmatprep.mubr.f32.mxu0 %v4266_v0 }
  0xc4   :  { %3522 = vmatmul.mubr.msk.f32.gmra.mrb[50].mxu0 %vm150_vm1, %v108_v45 }
  0xc5   :  { %568 = vmatprep.mubr.f32.mxu0 %v4266_v0 }
  0xc8   :  { %3523 = vmatmul.mubr.msk.f32.gmra.mrb[52].mxu0 %vm150_vm1, %v109_v46 }
  0xc9   :  { %574 = vmatprep.mubr.f32.mxu0 %v4266_v0 }
  0xcc   :  { %3524 = vmatmul.mubr.msk.f32.gmra.mrb[54].mxu0 %vm150_vm1, %v110_v47 }
  0xcd   :  { %580 = vmatprep.mubr.f32.mxu0 %v4266_v0 }
  0xd0   :  { %3525 = vmatmul.mubr.msk.f32.gmra.mrb[56].mxu0 %vm150_vm1, %v111_v48 }
  0xd1   :  { %586 = vmatprep.mubr.f32.mxu0 %v4266_v0 }
  0xd4   :  { %3526 = vmatmul.mubr.msk.f32.gmra.mrb[58].mxu0 %vm150_vm1, %v112_v49 }
  0xd5   :  { %592 = vmatprep.mubr.f32.mxu0 %v4266_v0 }
  0xd8   :  { %3527 = vmatmul.mubr.msk.f32.gmra.mrb[60].mxu0 %vm150_vm1, %v113_v50 }
  0xd9   :  { %598 = vmatprep.mubr.f32.mxu0 %v4266_v0 }
  0xdc   :  { %3528 = vmatmul.mubr.msk.f32.gmra.mrb[62].mxu0 %vm150_vm1, %v114_v51 }
  0xdd   :  { %604 = vmatprep.mubr.f32.mxu0 %v4266_v0 }
  0xe0   :  { %3529 = vmatmul.mubr.msk.f32.gmra.mrb[64].mxu0 %vm150_vm1, %v115_v52 }
  0xe1   :  { %610 = vmatprep.mubr.f32.mxu0 %v4266_v0 }
  0xe4   :  { %3530 = vmatmul.mubr.msk.f32.gmra.mrb[66].mxu0 %vm150_vm1, %v116_v53 }
  0xe5   :  { %616 = vmatprep.mubr.f32.mxu0 %v4266_v0 }
  0xe8   :  { %3531 = vmatmul.mubr.msk.f32.gmra.mrb[68].mxu0 %vm150_vm1, %v117_v54 }
  0xe9   :  { %622 = vmatprep.mubr.f32.mxu0 %v4266_v0 }
  0xec   :  { %3532 = vmatmul.mubr.msk.f32.gmra.mrb[70].mxu0 %vm150_vm1, %v118_v55 }
  0xed   :  { %628 = vmatprep.mubr.f32.mxu0 %v4266_v0 }
  0xf0   :  { %3533 = vmatmul.mubr.msk.f32.gmra.mrb[72].mxu0 %vm150_vm1, %v119_v56 }
  0xf1   :  { %634 = vmatprep.mubr.f32.mxu0 %v4266_v0 }
  0xf4   :  { %3534 = vmatmul.mubr.msk.f32.gmra.mrb[74].mxu0 %vm150_vm1, %v120_v57 }
  0xf5   :  { %640 = vmatprep.mubr.f32.mxu0 %v4266_v0 }
  0xf8   :  { %3535 = vmatmul.mubr.msk.f32.gmra.mrb[76].mxu0 %vm150_vm1, %v121_v58 }
  0xf9   :  { %646 = vmatprep.mubr.f32.mxu0 %v4266_v0 }
  0xfc   :  { %3536 = vmatmul.mubr.msk.f32.gmra.mrb[78].mxu0 %vm150_vm1, %v122_v59 }
  0xfd   :  { %652 = vmatprep.mubr.f32.mxu0 %v4266_v0 }
 0x100   :  { %3537 = vmatmul.mubr.msk.f32.gmra.mrb[80].mxu0 %vm150_vm1, %v123_v60 }
 0x101   :  { %658 = vmatprep.mubr.f32.mxu0 %v4266_v0 }
 0x104   :  { %3538 = vmatmul.mubr.msk.f32.gmra.mrb[82].mxu0 %vm150_vm1, %v124_v61 }
 0x105   :  { %664 = vmatprep.mubr.f32.mxu0 %v4266_v0 }
 0x108   :  { %3539 = vmatmul.mubr.msk.f32.gmra.mrb[84].mxu0 %vm150_vm1, %v125_v62 }
 0x109   :  { %670 = vmatprep.mubr.f32.mxu0 %v4266_v0 }
 0x10c   :  { %3540 = vmatmul.mubr.msk.f32.gmra.mrb[86].mxu0 %vm150_vm1, %v126_v63 }
 0x10d   :  { %676 = vmatprep.mubr.f32.mxu0 %v4266_v0 }
 0x110   :  { %3541 = vmatmul.mubr.msk.f32.gmra.mrb[88].mxu0 %vm150_vm1, %v127_v1 }
 0x111   :  { %682 = vmatprep.mubr.f32.mxu0 %v4266_v0 }
 0x114   :  { %3542 = vmatmul.mubr.msk.f32.gmra.mrb[90].mxu0 %vm150_vm1, %v128_v2 }
 0x115   :  { %688 = vmatprep.mubr.f32.mxu0 %v4266_v0 }
 0x118   :  { %3543 = vmatmul.mubr.msk.f32.gmra.mrb[92].mxu0 %vm150_vm1, %v129_v3 }
 0x119   :  { %694 = vmatprep.mubr.f32.mxu0 %v4266_v0 }
 0x11c   :  { %3544 = vmatmul.mubr.msk.f32.gmra.mrb[94].mxu0 %vm150_vm1, %v130_v4 }
 0x133   :  { %v414_v5 = vpop.f32.mrb[0].mxu0  ;;  %v702_v25 = vpop.f32.mrb[0].mxu1 }
 0x134   :  { %v4496_v6 = vpop.f32.mrb[1].mxu0  ;;  %v4526_v26 = vpop.f32.mrb[1].mxu1 }
 0x135   :  { %5001 = vst [vmem:[#allocation16_spill] sm:$0xff] %v4526_v26 }
 0x137   :  { %v420_v7 = vpop.f32.mrb[2].mxu0  ;;  %v708_v28 = vpop.f32.mrb[2].mxu1 }
 0x138   :  { %v3979_v8 = vpack.c.bf16 %v420_v7, %v414_v5  ;;  %v4498_v9 = vpop.f32.mrb[3].mxu0  ;;  %v4530_v30 = vpack.c.bf16 %v708_v28, %v702_v25  ;;  %v4536_v32 = vpop.f32.mrb[3].mxu1 }
 0x139   :  { %5002 = vst [vmem:[#allocation17_spill] sm:$0xff] %v4536_v32 }
 0x13a   :  { %3980 = vmatprep.subr.bf16.mxu1 %v3979_v8 }
 0x13b   :  { %v426_v10 = vpop.f32.mrb[4].mxu0  ;;  %3982 = vmatpush3.bf16.msra.mxu1 %v3979_v8  ;;  %v714_v35 = vpop.f32.mrb[4].mxu1 }
 0x13c   :  { %v4502_v12 = vpop.f32.mrb[5].mxu0  ;;  %v4540_v36 = vpop.f32.mrb[5].mxu1 }
 0x13d   :  { %5003 = vst [vmem:[#allocation18_spill] sm:$0xff] %v4540_v36 }
 0x13e   :  { %3760 = vmatmul.mubr.msk.f32.vlgmr.msra.gmra.mrb[32].mxu1 %vm801_vm2, %v4500_v11 }
 0x13f   :  { %v432_v0 = vpop.f32.mrb[6].mxu0  ;;  %3766 = vmatprep.mubr.msk.f32.mxu1 %vm801_vm2, %v4444_v43  ;;  %v720_v38 = vpop.f32.mrb[6].mxu1 }
 0x140   :  { %v3983_v13 = vpack.c.bf16 %v432_v0, %v426_v10  ;;  %v4508_v14 = vpop.f32.mrb[7].mxu0  ;;  %v4544_v40 = vpack.c.bf16 %v720_v38, %v714_v35  ;;  %v4550_v42 = vpop.f32.mrb[7].mxu1 }
 0x141   :  { %5004 = vst [vmem:[#allocation19_spill] sm:$0xff] %v4550_v42 }
 0x142   :  { %3984 = vmatprep.subr.bf16.mxu1 %v3983_v13 }
 0x143   :  { %v438_v15 = vpop.f32.mrb[8].mxu0  ;;  %3986 = vmatpush3.bf16.msra.mxu1 %v3983_v13  ;;  %v726_v46 = vpop.f32.mrb[8].mxu1 }
 0x144   :  { %v4510_v16 = vpop.f32.mrb[9].mxu0  ;;  %v4554_v47 = vpop.f32.mrb[9].mxu1 }
 0x145   :  { %5005 = vst [vmem:[#allocation20_spill] sm:$0xff] %v4554_v47 }
 0x146   :  { %3767 = vmatmul.mubr.msk.f32.vlgmr.msra.gmra.mrb[34].mxu1 %vm801_vm2, %v4500_v11 }
 0x147   :  { %v444_v17 = vpop.f32.mrb[10].mxu0  ;;  %3773 = vmatprep.mubr.msk.f32.mxu1 %vm801_vm2, %v4444_v43  ;;  %v732_v49 = vpop.f32.mrb[10].mxu1 }
 0x148   :  { %v3987_v18 = vpack.c.bf16 %v444_v17, %v438_v15  ;;  %v4516_v19 = vpop.f32.mrb[11].mxu0  ;;  %v4558_v51 = vpack.c.bf16 %v732_v49, %v726_v46  ;;  %v4564_v53 = vpop.f32.mrb[11].mxu1 }
 0x149   :  { %5006 = vst [vmem:[#allocation21_spill] sm:$0xff] %v4564_v53 }
 0x14a   :  { %3988 = vmatprep.subr.bf16.mxu1 %v3987_v18 }
 0x14b   :  { %v450_v20 = vpop.f32.mrb[12].mxu0  ;;  %3990 = vmatpush3.bf16.msra.mxu1 %v3987_v18  ;;  %v738_v56 = vpop.f32.mrb[12].mxu1 }
 0x14c   :  { %v4518_v21 = vpop.f32.mrb[13].mxu0  ;;  %v4568_v57 = vpop.f32.mrb[13].mxu1 }
 0x14d   :  { %5007 = vst [vmem:[#allocation22_spill] sm:$0xff] %v4568_v57 }
 0x14e   :  { %3774 = vmatmul.mubr.msk.f32.vlgmr.msra.gmra.mrb[36].mxu1 %vm801_vm2, %v4500_v11 }
 0x14f   :  { %v456_v22 = vpop.f32.mrb[14].mxu0  ;;  %3780 = vmatprep.mubr.msk.f32.mxu1 %vm801_vm2, %v4444_v43  ;;  %v744_v59 = vpop.f32.mrb[14].mxu1 }
 0x150   :  { %v3991_v23 = vpack.c.bf16 %v456_v22, %v450_v20  ;;  %v4524_v24 = vpop.f32.mrb[15].mxu0  ;;  %v4572_v61 = vpack.c.bf16 %v744_v59, %v738_v56  ;;  %v4578_v63 = vpop.f32.mrb[15].mxu1 }
 0x151   :  { %5008 = vst [vmem:[#allocation23_spill] sm:$0xff] %v4578_v63 }
 0x152   :  { %3992 = vmatprep.subr.bf16.mxu1 %v3991_v23 }
 0x153   :  { %v462_v27 = vpop.f32.mrb[16].mxu0  ;;  %3994 = vmatpush3.bf16.msra.mxu1 %v3991_v23  ;;  %v750_v3 = vpop.f32.mrb[16].mxu1 }
 0x154   :  { %v4528_v29 = vpop.f32.mrb[17].mxu0  ;;  %v4582_v4 = vpop.f32.mrb[17].mxu1 }
 0x155   :  { %5009 = vst [vmem:[#allocation24_spill] sm:$0xff] %v4582_v4 }
 0x156   :  { %3781 = vmatmul.mubr.msk.f32.vlgmr.msra.gmra.mrb[38].mxu1 %vm801_vm2, %v4500_v11 }
 0x157   :  { %v468_v31 = vpop.f32.mrb[18].mxu0  ;;  %3787 = vmatprep.mubr.msk.f32.mxu1 %vm801_vm2, %v4444_v43  ;;  %v756_v7 = vpop.f32.mrb[18].mxu1 }
 0x158   :  { %v3995_v33 = vpack.c.bf16 %v468_v31, %v462_v27  ;;  %v4538_v34 = vpop.f32.mrb[19].mxu0  ;;  %v4586_v10 = vpack.c.bf16 %v756_v7, %v750_v3  ;;  %v4590_v0 = vpop.f32.mrb[19].mxu1 }
 0x159   :  { %5010 = vst [vmem:[#allocation25_spill] sm:$0xff] %v4590_v0 }
 0x15a   :  { %3996 = vmatprep.subr.bf16.mxu1 %v3995_v33 }
 0x15b   :  { %v474_v37 = vpop.f32.mrb[20].mxu0  ;;  %3998 = vmatpush3.bf16.msra.mxu1 %v3995_v33  ;;  %v762_v18 = vpop.f32.mrb[20].mxu1 }
 0x15c   :  { %v4542_v39 = vpop.f32.mrb[21].mxu0  ;;  %v4596_v20 = vpop.f32.mrb[21].mxu1 }
 0x15d   :  { %5011 = vst [vmem:[#allocation26_spill] sm:$0xff] %v4596_v20 }
 0x15e   :  { %3788 = vmatmul.mubr.msk.f32.vlgmr.msra.gmra.mrb[40].mxu1 %vm801_vm2, %v4500_v11 }
 0x15f   :  { %v480_v41 = vpop.f32.mrb[22].mxu0  ;;  %3794 = vmatprep.mubr.msk.f32.mxu1 %vm801_vm2, %v4444_v43  ;;  %v768_v23 = vpop.f32.mrb[22].mxu1 }
 0x160   :  { %v3999_v44 = vpack.c.bf16 %v480_v41, %v474_v37  ;;  %v4552_v45 = vpop.f32.mrb[23].mxu0  ;;  %v4600_v27 = vpack.c.bf16 %v768_v23, %v762_v18  ;;  %v4604_v28 = vpop.f32.mrb[23].mxu1 }
 0x161   :  { %5012 = vst [vmem:[#allocation27_spill] sm:$0xff] %v4604_v28 }
 0x162   :  { %4000 = vmatprep.subr.bf16.mxu1 %v3999_v44 }
 0x163   :  { %v486_v48 = vpop.f32.mrb[24].mxu0  ;;  %4002 = vmatpush3.bf16.msra.mxu1 %v3999_v44  ;;  %v774_v37 = vpop.f32.mrb[24].mxu1 }
 0x164   :  { %v4556_v50 = vpop.f32.mrb[25].mxu0  ;;  %v4610_v38 = vpop.f32.mrb[25].mxu1 }
 0x165   :  { %5013 = vst [vmem:[#allocation28_spill] sm:$0xff] %v4610_v38 }
 0x166   :  { %3795 = vmatmul.mubr.msk.f32.vlgmr.msra.gmra.mrb[42].mxu1 %vm801_vm2, %v4500_v11 }
 0x167   :  { %v492_v52 = vpop.f32.mrb[26].mxu0  ;;  %3801 = vmatprep.mubr.msk.f32.mxu1 %vm801_vm2, %v4444_v43  ;;  %v780_v44 = vpop.f32.mrb[26].mxu1 }
 0x168   :  { %v4003_v54 = vpack.c.bf16 %v492_v52, %v486_v48  ;;  %v4566_v55 = vpop.f32.mrb[27].mxu0  ;;  %v4614_v48 = vpack.c.bf16 %v780_v44, %v774_v37  ;;  %v4618_v49 = vpop.f32.mrb[27].mxu1 }
 0x169   :  { %5014 = vst [vmem:[#allocation29_spill] sm:$0xff] %v4618_v49 }
 0x16a   :  { %4004 = vmatprep.subr.bf16.mxu1 %v4003_v54 }
 0x16b   :  { %v498_v58 = vpop.f32.mrb[28].mxu0  ;;  %4006 = vmatpush3.bf16.msra.mxu1 %v4003_v54 }
 0x16c   :  { %v4570_v60 = vpop.f32.mrb[29].mxu0 }
 0x16e   :  { %3802 = vmatmul.mubr.msk.f32.vlgmr.msra.gmra.mrb[44].mxu1 %vm801_vm2, %v4500_v11 }
 0x16f   :  { %v504_v62 = vpop.f32.mrb[30].mxu0  ;;  %3808 = vmatprep.mubr.msk.f32.mxu1 %vm801_vm2, %v4444_v43 }
 0x170   :  { %v4007_v1 = vpack.c.bf16 %v504_v62, %v498_v58  ;;  %v4580_v2 = vpop.f32.mrb[31].mxu0  ;;  %v786_v58 = vpop.f32.mrb[28].mxu1 }
 0x171   :  { %v4624_v59 = vpop.f32.mrb[29].mxu1 }
 0x172   :  { %4008 = vmatprep.subr.bf16.mxu1 %v4007_v1  ;;  %5015 = vst [vmem:[#allocation30_spill] sm:$0xff] %v4624_v59 }
 0x173   :  { %v510_v5 = vpop.f32.mrb[32].mxu0  ;;  %4010 = vmatpush3.bf16.msra.mxu1 %v4007_v1  ;;  %v792_v1 = vpop.f32.mrb[30].mxu1 }
 0x174   :  { %v4584_v8 = vpop.f32.mrb[33].mxu0  ;;  %v4632_v7 = vpop.f32.mrb[31].mxu1 }
 0x175   :  { %5016 = vst [vmem:[#allocation31_spill] sm:$0xff] %v4632_v7 }
 0x176   :  { %3809 = vmatmul.mubr.msk.f32.vlgmr.msra.gmra.mrb[46].mxu1 %vm801_vm2, %v4500_v11 }
 0x177   :  { %v516_v13 = vpop.f32.mrb[34].mxu0  ;;  %3815 = vmatprep.mubr.msk.f32.mxu1 %vm801_vm2, %v4444_v43 }
 0x178   :  { %v4011_v15 = vpack.c.bf16 %v516_v13, %v510_v5  ;;  %v4594_v17 = vpop.f32.mrb[35].mxu0  ;;  %v4628_v5 = vpack.c.bf16 %v792_v1, %v786_v58 }
 0x17a   :  { %4012 = vmatprep.subr.bf16.mxu1 %v4011_v15 }
 0x17b   :  { %v522_v22 = vpop.f32.mrb[36].mxu0  ;;  %4014 = vmatpush3.bf16.msra.mxu1 %v4011_v15 }
 0x17c   :  { %v4598_v25 = vpop.f32.mrb[37].mxu0 }
 0x17e   :  { %3816 = vmatmul.mubr.msk.f32.vlgmr.msra.gmra.mrb[48].mxu1 %vm801_vm2, %v4500_v11 }
 0x17f   :  { %v528_v31 = vpop.f32.mrb[38].mxu0  ;;  %3822 = vmatprep.mubr.msk.f32.mxu1 %vm801_vm2, %v4444_v43 }
 0x180   :  { %v4015_v33 = vpack.c.bf16 %v528_v31, %v522_v22  ;;  %v4608_v35 = vpop.f32.mrb[39].mxu0 }
 0x182   :  { %4016 = vmatprep.subr.bf16.mxu1 %v4015_v33 }
 0x183   :  { %v534_v41 = vpop.f32.mrb[40].mxu0  ;;  %4018 = vmatpush3.bf16.msra.mxu1 %v4015_v33 }
 0x184   :  { %v4612_v46 = vpop.f32.mrb[41].mxu0 }
 0x186   :  { %3823 = vmatmul.mubr.msk.f32.vlgmr.msra.gmra.mrb[50].mxu1 %vm801_vm2, %v4500_v11 }
 0x187   :  { %v540_v52 = vpop.f32.mrb[42].mxu0  ;;  %3829 = vmatprep.mubr.msk.f32.mxu1 %vm801_vm2, %v4444_v43 }
 0x188   :  { %v4019_v54 = vpack.c.bf16 %v540_v52, %v534_v41  ;;  %v4622_v56 = vpop.f32.mrb[43].mxu0 }
 0x18a   :  { %4020 = vmatprep.subr.bf16.mxu1 %v4019_v54 }
 0x18b   :  { %v546_v62 = vpop.f32.mrb[44].mxu0  ;;  %4022 = vmatpush3.bf16.msra.mxu1 %v4019_v54 }
 0x18c   :  { %v4626_v3 = vpop.f32.mrb[45].mxu0 }
 0x18e   :  { %3830 = vmatmul.mubr.msk.f32.vlgmr.msra.gmra.mrb[52].mxu1 %vm801_vm2, %v4500_v11 }
 0x18f   :  { %v552_v13 = vpop.f32.mrb[46].mxu0  ;;  %3836 = vmatprep.mubr.msk.f32.mxu1 %vm801_vm2, %v4444_v43 }
 0x190   :  { %v4023_v15 = vpack.c.bf16 %v552_v13, %v546_v62  ;;  %v4636_v18 = vpop.f32.mrb[47].mxu0 }
 0x192   :  { %4024 = vmatprep.subr.bf16.mxu1 %v4023_v15 }
 0x193   :  { %v558_v22 = vpop.f32.mrb[48].mxu0  ;;  %4026 = vmatpush3.bf16.msra.mxu1 %v4023_v15 }
 0x194   :  { %v4638_v23 = vpop.f32.mrb[49].mxu0 }
 0x196   :  { %3837 = vmatmul.mubr.msk.f32.vlgmr.msra.gmra.mrb[54].mxu1 %vm801_vm2, %v4500_v11 }
 0x197   :  { %v564_v31 = vpop.f32.mrb[50].mxu0  ;;  %3843 = vmatprep.mubr.msk.f32.mxu1 %vm801_vm2, %v4444_v43 }
 0x198   :  { %v4027_v33 = vpack.c.bf16 %v564_v31, %v558_v22  ;;  %v4644_v37 = vpop.f32.mrb[51].mxu0 }
 0x19a   :  { %4028 = vmatprep.subr.bf16.mxu1 %v4027_v33 }
 0x19b   :  { %v570_v41 = vpop.f32.mrb[52].mxu0  ;;  %4030 = vmatpush3.bf16.msra.mxu1 %v4027_v33 }
 0x19c   :  { %v4646_v44 = vpop.f32.mrb[53].mxu0 }
 0x19e   :  { %3844 = vmatmul.mubr.msk.f32.vlgmr.msra.gmra.mrb[56].mxu1 %vm801_vm2, %v4500_v11 }
 0x19f   :  { %v576_v52 = vpop.f32.mrb[54].mxu0  ;;  %3850 = vmatprep.mubr.msk.f32.mxu1 %vm801_vm2, %v4444_v43 }
 0x1a0   :  { %v4031_v54 = vpack.c.bf16 %v576_v52, %v570_v41  ;;  %v4652_v58 = vpop.f32.mrb[55].mxu0 }
 0x1a2   :  { %4032 = vmatprep.subr.bf16.mxu1 %v4031_v54 }
 0x1a3   :  { %v582_v62 = vpop.f32.mrb[56].mxu0  ;;  %4034 = vmatpush3.bf16.msra.mxu1 %v4031_v54 }
 0x1a4   :  { %v4654_v1 = vpop.f32.mrb[57].mxu0 }
 0x1a6   :  { %3851 = vmatmul.mubr.msk.f32.vlgmr.msra.gmra.mrb[58].mxu1 %vm801_vm2, %v4500_v11 }
 0x1a7   :  { %v588_v13 = vpop.f32.mrb[58].mxu0  ;;  %3857 = vmatprep.mubr.msk.f32.mxu1 %vm801_vm2, %v4444_v43 }
 0x1a8   :  { %v4035_v15 = vpack.c.bf16 %v588_v13, %v582_v62  ;;  %v4660_v22 = vpop.f32.mrb[59].mxu0 }
 0x1aa   :  { %4036 = vmatprep.subr.bf16.mxu1 %v4035_v15 }
 0x1ab   :  { %v594_v31 = vpop.f32.mrb[60].mxu0  ;;  %4038 = vmatpush3.bf16.msra.mxu1 %v4035_v15 }
 0x1ac   :  { %v4662_v33 = vpop.f32.mrb[61].mxu0 }
 0x1ae   :  { %3858 = vmatmul.mubr.msk.f32.vlgmr.msra.gmra.mrb[60].mxu1 %vm801_vm2, %v4500_v11 }
 0x1af   :  { %v600_v41 = vpop.f32.mrb[62].mxu0  ;;  %3864 = vmatprep.mubr.msk.f32.mxu1 %vm801_vm2, %v4444_v43 }
 0x1b0   :  { %v4039_v52 = vpack.c.bf16 %v600_v41, %v594_v31  ;;  %v4668_v54 = vpop.f32.mrb[63].mxu0 }
 0x1b2   :  { %4040 = vmatprep.subr.bf16.mxu1 %v4039_v52 }
 0x1b3   :  { %v606_v59 = vpop.f32.mrb[64].mxu0  ;;  %4042 = vmatpush3.bf16.msra.mxu1 %v4039_v52 }
 0x1b4   :  { %v4670_v62 = vpop.f32.mrb[65].mxu0 }
 0x1b6   :  { %3865 = vmatmul.mubr.msk.f32.vlgmr.msra.gmra.mrb[62].mxu1 %vm801_vm2, %v4500_v11 }
 0x1b7   :  { %v612_v13 = vpop.f32.mrb[66].mxu0  ;;  %3871 = vmatprep.mubr.msk.f32.mxu1 %vm801_vm2, %v4444_v43 }
 0x1b8   :  { %v4043_v15 = vpack.c.bf16 %v612_v13, %v606_v59  ;;  %v4676_v7 = vpop.f32.mrb[67].mxu0 }
 0x1ba   :  { %4044 = vmatprep.subr.bf16.mxu1 %v4043_v15 }
 0x1bb   :  { %v618_v38 = vpop.f32.mrb[68].mxu0  ;;  %4046 = vmatpush3.bf16.msra.mxu1 %v4043_v15 }
 0x1bc   :  { %v4678_v31 = vpop.f32.mrb[69].mxu0 }
 0x1be   :  { %3872 = vmatmul.mubr.msk.f32.vlgmr.msra.gmra.mrb[64].mxu1 %vm801_vm2, %v4500_v11 }
 0x1bf   :  { %v624_v41 = vpop.f32.mrb[70].mxu0  ;;  %3878 = vmatprep.mubr.msk.f32.mxu1 %vm801_vm2, %v4444_v43 }
 0x1c0   :  { %v4047_v52 = vpack.c.bf16 %v624_v41, %v618_v38  ;;  %v4684_v49 = vpop.f32.mrb[71].mxu0 }
 0x1c2   :  { %4048 = vmatprep.subr.bf16.mxu1 %v4047_v52 }
 0x1c3   :  { %v630_v20 = vpop.f32.mrb[72].mxu0  ;;  %4050 = vmatpush3.bf16.msra.mxu1 %v4047_v52 }
 0x1c4   :  { %v4686_v59 = vpop.f32.mrb[73].mxu0 }
 0x1c6   :  { %3879 = vmatmul.mubr.msk.f32.vlgmr.msra.gmra.mrb[66].mxu1 %vm801_vm2, %v4500_v11 }
 0x1c7   :  { %v636_v13 = vpop.f32.mrb[74].mxu0  ;;  %3885 = vmatprep.mubr.msk.f32.mxu1 %vm801_vm2, %v4444_v43 }
 0x1c8   :  { %v4051_v15 = vpack.c.bf16 %v636_v13, %v630_v20  ;;  %v4692_v28 = vpop.f32.mrb[75].mxu0 }
 0x1ca   :  { %4052 = vmatprep.subr.bf16.mxu1 %v4051_v15 }
 0x1cb   :  { %v642_v4 = vpop.f32.mrb[76].mxu0  ;;  %4054 = vmatpush3.bf16.msra.mxu1 %v4051_v15 }
 0x1cc   :  { %v4694_v38 = vpop.f32.mrb[77].mxu0 }
 0x1ce   :  { %3886 = vmatmul.mubr.msk.f32.vlgmr.msra.gmra.mrb[68].mxu1 %vm801_vm2, %v4500_v11 }
 0x1cf   :  { %v648_v41 = vpop.f32.mrb[78].mxu0  ;;  %3892 = vmatprep.mubr.msk.f32.mxu1 %vm801_vm2, %v4444_v43 }
 0x1d0   :  { %v4055_v52 = vpack.c.bf16 %v648_v41, %v642_v4  ;;  %v4700_v0 = vpop.f32.mrb[79].mxu0 }
 0x1d2   :  { %4056 = vmatprep.subr.bf16.mxu1 %v4055_v52 }
 0x1d3   :  { %v654_v57 = vpop.f32.mrb[80].mxu0  ;;  %4058 = vmatpush3.bf16.msra.mxu1 %v4055_v52 }
 0x1d4   :  { %v4702_v20 = vpop.f32.mrb[81].mxu0 }
 0x1d6   :  { %3893 = vmatmul.mubr.msk.f32.vlgmr.msra.gmra.mrb[70].mxu1 %vm801_vm2, %v4500_v11 }
 0x1d7   :  { %v660_v13 = vpop.f32.mrb[82].mxu0  ;;  %3899 = vmatprep.mubr.msk.f32.mxu1 %vm801_vm2, %v4444_v43 }
 0x1d8   :  { %v4059_v15 = vpack.c.bf16 %v660_v13, %v654_v57  ;;  %v4708_v63 = vpop.f32.mrb[83].mxu0 }
 0x1da   :  { %4060 = vmatprep.subr.bf16.mxu1 %v4059_v15 }
 0x1db   :  { %v666_v47 = vpop.f32.mrb[84].mxu0  ;;  %4062 = vmatpush3.bf16.msra.mxu1 %v4059_v15 }
 0x1dc   :  { %v4710_v4 = vpop.f32.mrb[85].mxu0 }
 0x1de   :  { %3900 = vmatmul.mubr.msk.f32.vlgmr.msra.gmra.mrb[72].mxu1 %vm801_vm2, %v4500_v11 }
 0x1df   :  { %v672_v41 = vpop.f32.mrb[86].mxu0  ;;  %3906 = vmatprep.mubr.msk.f32.mxu1 %vm801_vm2, %v4444_v43 }
 0x1e0   :  { %v4063_v52 = vpack.c.bf16 %v672_v41, %v666_v47  ;;  %v4716_v53 = vpop.f32.mrb[87].mxu0 }
 0x1e2   :  { %4064 = vmatprep.subr.bf16.mxu1 %v4063_v52 }
 0x1e3   :  { %v678_v36 = vpop.f32.mrb[88].mxu0  ;;  %4066 = vmatpush3.bf16.msra.mxu1 %v4063_v52 }
 0x1e4   :  { %v4718_v57 = vpop.f32.mrb[89].mxu0 }
 0x1e6   :  { %3907 = vmatmul.mubr.msk.f32.vlgmr.msra.gmra.mrb[74].mxu1 %vm801_vm2, %v4500_v11 }
 0x1e7   :  { %v684_v13 = vpop.f32.mrb[90].mxu0  ;;  %3913 = vmatprep.mubr.msk.f32.mxu1 %vm801_vm2, %v4444_v43 }
 0x1e8   :  { %v4067_v15 = vpack.c.bf16 %v684_v13, %v678_v36  ;;  %v4724_v42 = vpop.f32.mrb[91].mxu0 }
 0x1ea   :  { %4068 = vmatprep.subr.bf16.mxu1 %v4067_v15 }
 0x1eb   :  { %v690_v26 = vpop.f32.mrb[92].mxu0  ;;  %4070 = vmatpush3.bf16.msra.mxu1 %v4067_v15 }
 0x1ec   :  { %v4726_v47 = vpop.f32.mrb[93].mxu0 }
 0x1ee   :  { %3914 = vmatmul.mubr.msk.f32.vlgmr.msra.gmra.mrb[76].mxu1 %vm801_vm2, %v4500_v11 }
 0x1ef   :  { %v696_v41 = vpop.f32.mrb[94].mxu0  ;;  %3920 = vmatprep.mubr.msk.f32.mxu1 %vm801_vm2, %v4444_v43 }
 0x1f0   :  { %v4071_v52 = vpack.c.bf16 %v696_v41, %v690_v26  ;;  %v4732_v32 = vpop.f32.mrb[95].mxu0  ;;  %v4777_v26 = vld [vmem:[#allocation8] ss:$0 sm:$0xff] }
 0x1f2   :  { %4072 = vmatprep.subr.bf16.mxu1 %v4071_v52 }
 0x1f3   :  { %4074 = vmatpush3.bf16.msra.mxu1 %v4071_v52 }
 0x1f4   :  { %4076 = vmatprep.subr.bf16.mxu1 %v4530_v30 }
 0x1f6   :  { %3921 = vmatmul.mubr.msk.f32.vlgmr.msra.gmra.mrb[78].mxu1 %vm801_vm2, %v4500_v11 }
 0x1f7   :  { %4078 = vmatpush3.bf16.msra.mxu1 %v4530_v30  ;;  %3927 = vmatprep.mubr.msk.f32.mxu1 %vm801_vm2, %v4444_v43 }
 0x1f8   :  { %4080 = vmatprep.subr.bf16.mxu1 %v4544_v40 }
 0x1fa   :  { %3928 = vmatmul.mubr.msk.f32.vlgmr.msra.gmra.mrb[80].mxu1 %vm801_vm2, %v4500_v11 }
 0x1fb   :  { %4082 = vmatpush3.bf16.msra.mxu1 %v4544_v40  ;;  %3934 = vmatprep.mubr.msk.f32.mxu1 %vm801_vm2, %v4444_v43 }
 0x1fc   :  { %4084 = vmatprep.subr.bf16.mxu1 %v4558_v51 }
 0x1fe   :  { %3935 = vmatmul.mubr.msk.f32.vlgmr.msra.gmra.mrb[82].mxu1 %vm801_vm2, %v4500_v11 }
 0x1ff   :  { %4086 = vmatpush3.bf16.msra.mxu1 %v4558_v51  ;;  %3941 = vmatprep.mubr.msk.f32.mxu1 %vm801_vm2, %v4444_v43  ;;  %v4782_v51 = vld [vmem:[#allocation10] ss:$0 sm:$0xff] }
 0x200   :  { %4088 = vmatprep.subr.bf16.mxu1 %v4572_v61 }
 0x202   :  { %3942 = vmatmul.mubr.msk.f32.vlgmr.msra.gmra.mrb[84].mxu1 %vm801_vm2, %v4500_v11 }
 0x203   :  { %4090 = vmatpush3.bf16.msra.mxu1 %v4572_v61  ;;  %3948 = vmatprep.mubr.msk.f32.mxu1 %vm801_vm2, %v4444_v43 }
 0x204   :  { %4092 = vmatprep.subr.bf16.mxu1 %v4586_v10 }
 0x206   :  { %3949 = vmatmul.mubr.msk.f32.vlgmr.msra.gmra.mrb[86].mxu1 %vm801_vm2, %v4500_v11 }
 0x207   :  { %4094 = vmatpush3.bf16.msra.mxu1 %v4586_v10  ;;  %3955 = vmatprep.mubr.msk.f32.mxu1 %vm801_vm2, %v4444_v43 }
 0x208   :  { %4096 = vmatprep.subr.bf16.mxu1 %v4600_v27 }
 0x20a   :  { %3956 = vmatmul.mubr.msk.f32.vlgmr.msra.gmra.mrb[88].mxu1 %vm801_vm2, %v4500_v11 }
 0x20b   :  { %4098 = vmatpush3.bf16.msra.mxu1 %v4600_v27  ;;  %3962 = vmatprep.mubr.msk.f32.mxu1 %vm801_vm2, %v4444_v43 }
 0x20c   :  { %4100 = vmatprep.subr.bf16.mxu1 %v4614_v48 }
 0x20e   :  { %3963 = vmatmul.mubr.msk.f32.vlgmr.msra.gmra.mrb[90].mxu1 %vm801_vm2, %v4500_v11 }
 0x20f   :  { %4102 = vmatpush3.bf16.msra.mxu1 %v4614_v48  ;;  %3969 = vmatprep.mubr.msk.f32.mxu1 %vm801_vm2, %v4444_v43 }
 0x210   :  { %4104 = vmatprep.subr.bf16.mxu1 %v4628_v5 }
 0x211   :  { %v3761_v30 = vpop.f32.mrb[32].mxu1 }
 0x212   :  { %v880_v36 = vadd.f32 %v3761_v30, %v4498_v9  ;;  %v874_v40 = vpop.f32.mrb[33].mxu1  ;;  %3970 = vmatmul.mubr.msk.f32.vlgmr.msra.gmra.mrb[92].mxu1 %vm801_vm2, %v4500_v11 }
 0x213   :  { %v875_v61 = vadd.f32 %v874_v40, %v4496_v6  ;;  %4106 = vmatpush3.bf16.msra.mxu1 %v4628_v5  ;;  %3976 = vmatprep.mubr.msk.f32.mxu1 %vm801_vm2, %v4444_v43 }
 0x214   :  { %v3215_v10 = vmul.f32 %v4777_v26, %v880_v36 }
 0x215   :  { %v3214_v27 = vmul.f32 %v4777_v26, %v875_v61 }
 0x216   :  { %v3285_v48 = vadd.f32 %v4782_v51, %v3215_v10  ;;  %3977 = vmatmul.mubr.msk.f32.vlgmr.msra.gmra.mrb[94].mxu1 %vm801_vm2, %v4500_v11 }
 0x217   :  { %v3284_v9 = vadd.f32 %v4782_v51, %v3214_v27 }
 0x218   :  { %v3349_v13 = vmax.f32 %v3285_v48, 0.0 }
 0x219   :  { %v3348_v15 = vmax.f32 %v3284_v9, 0.0  ;;  %v3768_v41 = vpop.f32.mrb[34].mxu1 }
 0x21a   :  { %3413 = vst [vmem:[#allocation11 + $0x8] sm:$0xff] %v3349_v13  ;;  %v955_v6 = vadd.f32 %v3768_v41, %v4508_v14  ;;  %v949_v5 = vpop.f32.mrb[35].mxu1 }
 0x21b   :  { %3412 = vst [vmem:[#allocation11] sm:$0xff] %v3348_v15  ;;  %v950_v43 = vadd.f32 %v949_v5, %v4502_v12 }
 0x21c   :  { %v3217_v52 = vmul.f32 %v4777_v26, %v955_v6 }
 0x21d   :  { %v3216_v30 = vmul.f32 %v4777_v26, %v950_v43 }
 0x21e   :  { %v3287_v36 = vadd.f32 %v4782_v51, %v3217_v52 }
 0x21f   :  { %v3286_v11 = vadd.f32 %v4782_v51, %v3216_v30 }
 0x220   :  { %v3351_v40 = vmax.f32 %v3287_v36, 0.0 }
 0x221   :  { %v3350_v61 = vmax.f32 %v3286_v11, 0.0  ;;  %v3775_v10 = vpop.f32.mrb[36].mxu1 }
 0x222   :  { %3415 = vst [vmem:[#allocation11 + $0x18] sm:$0xff] %v3351_v40  ;;  %v1030_v27 = vadd.f32 %v3775_v10, %v4516_v19  ;;  %v1024_v48 = vpop.f32.mrb[37].mxu1 }
 0x223   :  { %3414 = vst [vmem:[#allocation11 + $0x10] sm:$0xff] %v3350_v61  ;;  %v1025_v14 = vadd.f32 %v1024_v48, %v4510_v16 }
 0x224   :  { %v3219_v12 = vmul.f32 %v4777_v26, %v1030_v27 }
 0x225   :  { %v3218_v9 = vmul.f32 %v4777_v26, %v1025_v14 }
 0x226   :  { %v3289_v13 = vadd.f32 %v4782_v51, %v3219_v12 }
 0x227   :  { %v3288_v15 = vadd.f32 %v4782_v51, %v3218_v9 }
 0x228   :  { %v3353_v41 = vmax.f32 %v3289_v13, 0.0 }
 0x229   :  { %v3352_v6 = vmax.f32 %v3288_v15, 0.0  ;;  %v3782_v5 = vpop.f32.mrb[38].mxu1 }
 0x22a   :  { %3417 = vst [vmem:[#allocation11 + $0x28] sm:$0xff] %v3353_v41  ;;  %v1105_v43 = vadd.f32 %v3782_v5, %v4524_v24  ;;  %v1099_v52 = vpop.f32.mrb[39].mxu1 }
 0x22b   :  { %3416 = vst [vmem:[#allocation11 + $0x20] sm:$0xff] %v3352_v6  ;;  %v1100_v19 = vadd.f32 %v1099_v52, %v4518_v21 }
 0x22c   :  { %v3221_v16 = vmul.f32 %v4777_v26, %v1105_v43 }
 0x22d   :  { %v3220_v30 = vmul.f32 %v4777_v26, %v1100_v19 }
 0x22e   :  { %v3291_v36 = vadd.f32 %v4782_v51, %v3221_v16 }
 0x22f   :  { %v3290_v11 = vadd.f32 %v4782_v51, %v3220_v30 }
 0x230   :  { %v3355_v40 = vmax.f32 %v3291_v36, 0.0 }
 0x231   :  { %v3354_v61 = vmax.f32 %v3290_v11, 0.0  ;;  %v3789_v10 = vpop.f32.mrb[40].mxu1 }
 0x232   :  { %3419 = vst [vmem:[#allocation11 + $0x38] sm:$0xff] %v3355_v40  ;;  %v1180_v27 = vadd.f32 %v3789_v10, %v4538_v34  ;;  %v1174_v48 = vpop.f32.mrb[41].mxu1 }
 0x233   :  { %3418 = vst [vmem:[#allocation11 + $0x30] sm:$0xff] %v3354_v61  ;;  %v1175_v24 = vadd.f32 %v1174_v48, %v4528_v29 }
 0x234   :  { %v3223_v21 = vmul.f32 %v4777_v26, %v1180_v27 }
 0x235   :  { %v3222_v14 = vmul.f32 %v4777_v26, %v1175_v24 }
 0x236   :  { %v3293_v12 = vadd.f32 %v4782_v51, %v3223_v21 }
 0x237   :  { %v3292_v9 = vadd.f32 %v4782_v51, %v3222_v14 }
 0x238   :  { %v3357_v13 = vmax.f32 %v3293_v12, 0.0 }
 0x239   :  { %v3356_v15 = vmax.f32 %v3292_v9, 0.0  ;;  %v3796_v41 = vpop.f32.mrb[42].mxu1 }
 0x23a   :  { %3421 = vst [vmem:[#allocation11 + $0x48] sm:$0xff] %v3357_v13  ;;  %v1255_v6 = vadd.f32 %v3796_v41, %v4552_v45  ;;  %v1249_v5 = vpop.f32.mrb[43].mxu1 }
 0x23b   :  { %3420 = vst [vmem:[#allocation11 + $0x40] sm:$0xff] %v3356_v15  ;;  %v1250_v34 = vadd.f32 %v1249_v5, %v4542_v39 }
 0x23c   :  { %v3225_v29 = vmul.f32 %v4777_v26, %v1255_v6 }
 0x23d   :  { %v3224_v43 = vmul.f32 %v4777_v26, %v1250_v34 }
 0x23e   :  { %v3295_v52 = vadd.f32 %v4782_v51, %v3225_v29 }
 0x23f   :  { %v3294_v19 = vadd.f32 %v4782_v51, %v3224_v43 }
 0x240   :  { %v3359_v16 = vmax.f32 %v3295_v52, 0.0 }
 0x241   :  { %v3358_v30 = vmax.f32 %v3294_v19, 0.0  ;;  %v3803_v36 = vpop.f32.mrb[44].mxu1 }
 0x242   :  { %3423 = vst [vmem:[#allocation11 + $0x58] sm:$0xff] %v3359_v16  ;;  %v1330_v11 = vadd.f32 %v3803_v36, %v4566_v55  ;;  %v1324_v40 = vpop.f32.mrb[45].mxu1 }
 0x243   :  { %3422 = vst [vmem:[#allocation11 + $0x50] sm:$0xff] %v3358_v30  ;;  %v1325_v45 = vadd.f32 %v1324_v40, %v4556_v50 }
 0x244   :  { %v3227_v39 = vmul.f32 %v4777_v26, %v1330_v11 }
 0x245   :  { %v3226_v61 = vmul.f32 %v4777_v26, %v1325_v45 }
 0x246   :  { %v3297_v10 = vadd.f32 %v4782_v51, %v3227_v39 }
 0x247   :  { %v3296_v27 = vadd.f32 %v4782_v51, %v3226_v61 }
 0x248   :  { %v3361_v48 = vmax.f32 %v3297_v10, 0.0 }
 0x249   :  { %v3360_v24 = vmax.f32 %v3296_v27, 0.0  ;;  %v3810_v21 = vpop.f32.mrb[46].mxu1 }
 0x24a   :  { %3425 = vst [vmem:[#allocation11 + $0x68] sm:$0xff] %v3361_v48  ;;  %v1405_v14 = vadd.f32 %v3810_v21, %v4580_v2  ;;  %v1399_v12 = vpop.f32.mrb[47].mxu1 }
 0x24b   :  { %3424 = vst [vmem:[#allocation11 + $0x60] sm:$0xff] %v3360_v24  ;;  %v1400_v55 = vadd.f32 %v1399_v12, %v4570_v60 }
 0x24c   :  { %v3229_v50 = vmul.f32 %v4777_v26, %v1405_v14 }
 0x24d   :  { %v3228_v9 = vmul.f32 %v4777_v26, %v1400_v55 }
 0x24e   :  { %v3299_v13 = vadd.f32 %v4782_v51, %v3229_v50 }
 0x24f   :  { %v3298_v15 = vadd.f32 %v4782_v51, %v3228_v9 }
 0x250   :  { %v3363_v41 = vmax.f32 %v3299_v13, 0.0 }
 0x251   :  { %v3362_v6 = vmax.f32 %v3298_v15, 0.0  ;;  %v3817_v5 = vpop.f32.mrb[48].mxu1 }
 0x252   :  { %3427 = vst [vmem:[#allocation11 + $0x78] sm:$0xff] %v3363_v41  ;;  %v1480_v34 = vadd.f32 %v3817_v5, %v4594_v17  ;;  %v1474_v29 = vpop.f32.mrb[49].mxu1 }
 0x253   :  { %3426 = vst [vmem:[#allocation11 + $0x70] sm:$0xff] %v3362_v6  ;;  %v1475_v2 = vadd.f32 %v1474_v29, %v4584_v8 }
 0x254   :  { %v3231_v60 = vmul.f32 %v4777_v26, %v1480_v34 }
 0x255   :  { %v3230_v43 = vmul.f32 %v4777_v26, %v1475_v2 }
 0x256   :  { %v3301_v52 = vadd.f32 %v4782_v51, %v3231_v60 }
 0x257   :  { %v3300_v19 = vadd.f32 %v4782_v51, %v3230_v43 }
 0x258   :  { %v3365_v16 = vmax.f32 %v3301_v52, 0.0 }
 0x259   :  { %v3364_v30 = vmax.f32 %v3300_v19, 0.0  ;;  %v3824_v36 = vpop.f32.mrb[50].mxu1 }
 0x25a   :  { %3429 = vst [vmem:[#allocation11 + $0x88] sm:$0xff] %v3365_v16  ;;  %v1555_v11 = vadd.f32 %v3824_v36, %v4608_v35  ;;  %v1549_v40 = vpop.f32.mrb[51].mxu1 }
 0x25b   :  { %3428 = vst [vmem:[#allocation11 + $0x80] sm:$0xff] %v3364_v30  ;;  %v1550_v17 = vadd.f32 %v1549_v40, %v4598_v25 }
 0x25c   :  { %v3233_v8 = vmul.f32 %v4777_v26, %v1555_v11 }
 0x25d   :  { %v3232_v45 = vmul.f32 %v4777_v26, %v1550_v17 }
 0x25e   :  { %v3303_v39 = vadd.f32 %v4782_v51, %v3233_v8 }
 0x25f   :  { %v3302_v61 = vadd.f32 %v4782_v51, %v3232_v45 }
 0x260   :  { %v3367_v10 = vmax.f32 %v3303_v39, 0.0 }
 0x261   :  { %v3366_v27 = vmax.f32 %v3302_v61, 0.0  ;;  %v3831_v48 = vpop.f32.mrb[52].mxu1 }
 0x262   :  { %3431 = vst [vmem:[#allocation11 + $0x98] sm:$0xff] %v3367_v10  ;;  %v1630_v24 = vadd.f32 %v3831_v48, %v4622_v56  ;;  %v1624_v21 = vpop.f32.mrb[53].mxu1 }
 0x263   :  { %3430 = vst [vmem:[#allocation11 + $0x90] sm:$0xff] %v3366_v27  ;;  %v1625_v35 = vadd.f32 %v1624_v21, %v4612_v46 }
 0x264   :  { %v3235_v25 = vmul.f32 %v4777_v26, %v1630_v24 }
 0x265   :  { %v3234_v14 = vmul.f32 %v4777_v26, %v1625_v35 }
 0x266   :  { %v3305_v12 = vadd.f32 %v4782_v51, %v3235_v25 }
 0x267   :  { %v3304_v55 = vadd.f32 %v4782_v51, %v3234_v14 }
 0x268   :  { %v3369_v50 = vmax.f32 %v3305_v12, 0.0 }
 0x269   :  { %v3368_v9 = vmax.f32 %v3304_v55, 0.0  ;;  %v3838_v13 = vpop.f32.mrb[54].mxu1 }
 0x26a   :  { %3433 = vst [vmem:[#allocation11 + $0xa8] sm:$0xff] %v3369_v50  ;;  %v1705_v15 = vadd.f32 %v3838_v13, %v4636_v18  ;;  %v1699_v41 = vpop.f32.mrb[55].mxu1 }
 0x26b   :  { %3432 = vst [vmem:[#allocation11 + $0xa0] sm:$0xff] %v3368_v9  ;;  %v1700_v56 = vadd.f32 %v1699_v41, %v4626_v3 }
 0x26c   :  { %v3237_v46 = vmul.f32 %v4777_v26, %v1705_v15 }
 0x26d   :  { %v3236_v6 = vmul.f32 %v4777_v26, %v1700_v56 }
 0x26e   :  { %v3307_v5 = vadd.f32 %v4782_v51, %v3237_v46 }
 0x26f   :  { %v3306_v34 = vadd.f32 %v4782_v51, %v3236_v6 }
 0x270   :  { %v3371_v29 = vmax.f32 %v3307_v5, 0.0 }
 0x271   :  { %v3370_v2 = vmax.f32 %v3306_v34, 0.0  ;;  %v3845_v60 = vpop.f32.mrb[56].mxu1 }
 0x272   :  { %3435 = vst [vmem:[#allocation11 + $0xb8] sm:$0xff] %v3371_v29  ;;  %v1780_v43 = vadd.f32 %v3845_v60, %v4644_v37  ;;  %v1774_v52 = vpop.f32.mrb[57].mxu1 }
 0x273   :  { %3434 = vst [vmem:[#allocation11 + $0xb0] sm:$0xff] %v3370_v2  ;;  %v1775_v18 = vadd.f32 %v1774_v52, %v4638_v23 }
 0x274   :  { %v3239_v3 = vmul.f32 %v4777_v26, %v1780_v43 }
 0x275   :  { %v3238_v19 = vmul.f32 %v4777_v26, %v1775_v18 }
 0x276   :  { %v3309_v16 = vadd.f32 %v4782_v51, %v3239_v3 }
 0x277   :  { %v3308_v30 = vadd.f32 %v4782_v51, %v3238_v19 }
 0x278   :  { %v3373_v36 = vmax.f32 %v3309_v16, 0.0 }
 0x279   :  { %v3372_v11 = vmax.f32 %v3308_v30, 0.0  ;;  %v3852_v40 = vpop.f32.mrb[58].mxu1 }
 0x27a   :  { %3437 = vst [vmem:[#allocation11 + $0xc8] sm:$0xff] %v3373_v36  ;;  %v1855_v17 = vadd.f32 %v3852_v40, %v4652_v58  ;;  %v1849_v8 = vpop.f32.mrb[59].mxu1 }
 0x27b   :  { %3436 = vst [vmem:[#allocation11 + $0xc0] sm:$0xff] %v3372_v11  ;;  %v1850_v37 = vadd.f32 %v1849_v8, %v4646_v44 }
 0x27c   :  { %v3241_v23 = vmul.f32 %v4777_v26, %v1855_v17 }
 0x27d   :  { %v3240_v45 = vmul.f32 %v4777_v26, %v1850_v37 }
 0x27e   :  { %v3311_v39 = vadd.f32 %v4782_v51, %v3241_v23 }
 0x27f   :  { %v3310_v61 = vadd.f32 %v4782_v51, %v3240_v45 }
 0x280   :  { %v3375_v10 = vmax.f32 %v3311_v39, 0.0 }
 0x281   :  { %v3374_v27 = vmax.f32 %v3310_v61, 0.0  ;;  %v3859_v48 = vpop.f32.mrb[60].mxu1 }
 0x282   :  { %3439 = vst [vmem:[#allocation11 + $0xd8] sm:$0xff] %v3375_v10  ;;  %v1930_v24 = vadd.f32 %v3859_v48, %v4660_v22  ;;  %v1924_v21 = vpop.f32.mrb[61].mxu1 }
 0x283   :  { %3438 = vst [vmem:[#allocation11 + $0xd0] sm:$0xff] %v3374_v27  ;;  %v1925_v58 = vadd.f32 %v1924_v21, %v4654_v1 }
 0x284   :  { %v3243_v44 = vmul.f32 %v4777_v26, %v1930_v24 }
 0x285   :  { %v3242_v35 = vmul.f32 %v4777_v26, %v1925_v58 }
 0x286   :  { %v3313_v25 = vadd.f32 %v4782_v51, %v3243_v44 }
 0x287   :  { %v3312_v14 = vadd.f32 %v4782_v51, %v3242_v35 }
 0x288   :  { %v3377_v12 = vmax.f32 %v3313_v25, 0.0 }
 0x289   :  { %v3376_v55 = vmax.f32 %v3312_v14, 0.0  ;;  %v3866_v50 = vpop.f32.mrb[62].mxu1 }
 0x28a   :  { %3441 = vst [vmem:[#allocation11 + $0xe8] sm:$0xff] %v3377_v12  ;;  %v2005_v9 = vadd.f32 %v3866_v50, %v4668_v54  ;;  %v1999_v13 = vpop.f32.mrb[63].mxu1 }
 0x28b   :  { %3440 = vst [vmem:[#allocation11 + $0xe0] sm:$0xff] %v3376_v55  ;;  %v2000_v22 = vadd.f32 %v1999_v13, %v4662_v33 }
 0x28c   :  { %v3245_v1 = vmul.f32 %v4777_v26, %v2005_v9 }
 0x28d   :  { %v3244_v15 = vmul.f32 %v4777_v26, %v2000_v22 }
 0x28e   :  { %v3315_v41 = vadd.f32 %v4782_v51, %v3245_v1 }
 0x28f   :  { %v3314_v56 = vadd.f32 %v4782_v51, %v3244_v15 }
 0x290   :  { %v3379_v46 = vmax.f32 %v3315_v41, 0.0 }
 0x291   :  { %v3378_v6 = vmax.f32 %v3314_v56, 0.0  ;;  %v3873_v5 = vpop.f32.mrb[64].mxu1 }
 0x292   :  { %3443 = vst [vmem:[#allocation11 + $0xf8] sm:$0xff] %v3379_v46  ;;  %v2080_v34 = vadd.f32 %v3873_v5, %v4676_v7  ;;  %v2074_v29 = vpop.f32.mrb[65].mxu1 }
 0x293   :  { %3442 = vst [vmem:[#allocation11 + $0xf0] sm:$0xff] %v3378_v6  ;;  %v2075_v54 = vadd.f32 %v2074_v29, %v4670_v62 }
 0x294   :  { %v3247_v33 = vmul.f32 %v4777_v26, %v2080_v34 }
 0x295   :  { %v3246_v2 = vmul.f32 %v4777_v26, %v2075_v54 }
 0x296   :  { %v3317_v60 = vadd.f32 %v4782_v51, %v3247_v33 }
 0x297   :  { %v3316_v43 = vadd.f32 %v4782_v51, %v3246_v2 }
 0x298   :  { %v3381_v52 = vmax.f32 %v3317_v60, 0.0 }
 0x299   :  { %v3380_v18 = vmax.f32 %v3316_v43, 0.0  ;;  %v3880_v3 = vpop.f32.mrb[66].mxu1 }
 0x29a   :  { %3445 = vst [vmem:[#allocation11 + $0x108] sm:$0xff] %v3381_v52  ;;  %v2155_v19 = vadd.f32 %v3880_v3, %v4684_v49  ;;  %v2149_v16 = vpop.f32.mrb[67].mxu1 }
 0x29b   :  { %3444 = vst [vmem:[#allocation11 + $0x100] sm:$0xff] %v3380_v18  ;;  %v2150_v7 = vadd.f32 %v2149_v16, %v4678_v31 }
 0x29c   :  { %v3249_v62 = vmul.f32 %v4777_v26, %v2155_v19 }
 0x29d   :  { %v3248_v30 = vmul.f32 %v4777_v26, %v2150_v7 }
 0x29e   :  { %v3319_v36 = vadd.f32 %v4782_v51, %v3249_v62 }
 0x29f   :  { %v3318_v11 = vadd.f32 %v4782_v51, %v3248_v30 }
 0x2a0   :  { %v3383_v40 = vmax.f32 %v3319_v36, 0.0 }
 0x2a1   :  { %v3382_v17 = vmax.f32 %v3318_v11, 0.0  ;;  %v3887_v8 = vpop.f32.mrb[68].mxu1 }
 0x2a2   :  { %3447 = vst [vmem:[#allocation11 + $0x118] sm:$0xff] %v3383_v40  ;;  %v2230_v37 = vadd.f32 %v3887_v8, %v4692_v28  ;;  %v2224_v23 = vpop.f32.mrb[69].mxu1  ;;  %v5017_v40 = vld [vmem:[#allocation17_spill] sm:$0xff] }
 0x2a3   :  { %3446 = vst [vmem:[#allocation11 + $0x110] sm:$0xff] %v3382_v17  ;;  %v2225_v49 = vadd.f32 %v2224_v23, %v4686_v59  ;;  %v5018_v23 = vld [vmem:[#allocation16_spill] sm:$0xff] }
 0x2a4   :  { %v3251_v31 = vmul.f32 %v4777_v26, %v2230_v37 }
 0x2a5   :  { %v3250_v45 = vmul.f32 %v4777_v26, %v2225_v49 }
 0x2a6   :  { %v3321_v39 = vadd.f32 %v4782_v51, %v3251_v31 }
 0x2a7   :  { %v3320_v61 = vadd.f32 %v4782_v51, %v3250_v45 }
 0x2a8   :  { %v3385_v10 = vmax.f32 %v3321_v39, 0.0 }
 0x2a9   :  { %v3384_v27 = vmax.f32 %v3320_v61, 0.0  ;;  %v3894_v48 = vpop.f32.mrb[70].mxu1 }
 0x2aa   :  { %3449 = vst [vmem:[#allocation11 + $0x128] sm:$0xff] %v3385_v10  ;;  %v2305_v24 = vadd.f32 %v3894_v48, %v4700_v0  ;;  %v2299_v21 = vpop.f32.mrb[71].mxu1  ;;  %v5019_v10 = vld [vmem:[#allocation19_spill] sm:$0xff] }
 0x2ab   :  { %3448 = vst [vmem:[#allocation11 + $0x120] sm:$0xff] %v3384_v27  ;;  %v2300_v28 = vadd.f32 %v2299_v21, %v4694_v38  ;;  %v5020_v21 = vld [vmem:[#allocation18_spill] sm:$0xff] }
 0x2ac   :  { %v3253_v59 = vmul.f32 %v4777_v26, %v2305_v24 }
 0x2ad   :  { %v3252_v58 = vmul.f32 %v4777_v26, %v2300_v28 }
 0x2ae   :  { %v3323_v44 = vadd.f32 %v4782_v51, %v3253_v59 }
 0x2af   :  { %v3322_v35 = vadd.f32 %v4782_v51, %v3252_v58 }
 0x2b0   :  { %v3387_v25 = vmax.f32 %v3323_v44, 0.0 }
 0x2b1   :  { %v3386_v14 = vmax.f32 %v3322_v35, 0.0  ;;  %v3901_v12 = vpop.f32.mrb[72].mxu1 }
 0x2b2   :  { %3451 = vst [vmem:[#allocation11 + $0x138] sm:$0xff] %v3387_v25  ;;  %v2380_v55 = vadd.f32 %v3901_v12, %v4708_v63  ;;  %v2374_v50 = vpop.f32.mrb[73].mxu1  ;;  %v5021_v12 = vld [vmem:[#allocation21_spill] sm:$0xff] }
 0x2b3   :  { %3450 = vst [vmem:[#allocation11 + $0x130] sm:$0xff] %v3386_v14  ;;  %v2375_v0 = vadd.f32 %v2374_v50, %v4702_v20 }
 0x2b4   :  { %v3255_v38 = vmul.f32 %v4777_v26, %v2380_v55 }
 0x2b5   :  { %v3254_v9 = vmul.f32 %v4777_v26, %v2375_v0 }
 0x2b6   :  { %v3325_v13 = vadd.f32 %v4782_v51, %v3255_v38  ;;  %v5022_v38 = vld [vmem:[#allocation20_spill] sm:$0xff] }
 0x2b7   :  { %v3324_v22 = vadd.f32 %v4782_v51, %v3254_v9 }
 0x2b8   :  { %v3389_v1 = vmax.f32 %v3325_v13, 0.0 }
 0x2b9   :  { %v3388_v15 = vmax.f32 %v3324_v22, 0.0  ;;  %v3908_v41 = vpop.f32.mrb[74].mxu1 }
 0x2ba   :  { %3453 = vst [vmem:[#allocation11 + $0x148] sm:$0xff] %v3389_v1  ;;  %v2455_v56 = vadd.f32 %v3908_v41, %v4716_v53  ;;  %v2449_v46 = vpop.f32.mrb[75].mxu1 }
 0x2bb   :  { %3452 = vst [vmem:[#allocation11 + $0x140] sm:$0xff] %v3388_v15  ;;  %v2450_v63 = vadd.f32 %v2449_v46, %v4710_v4  ;;  %v5023_v46 = vld [vmem:[#allocation23_spill] sm:$0xff] }
 0x2bc   :  { %v3257_v20 = vmul.f32 %v4777_v26, %v2455_v56 }
 0x2bd   :  { %v3256_v6 = vmul.f32 %v4777_v26, %v2450_v63 }
 0x2be   :  { %v3327_v5 = vadd.f32 %v4782_v51, %v3257_v20 }
 0x2bf   :  { %v3326_v34 = vadd.f32 %v4782_v51, %v3256_v6 }
 0x2c0   :  { %v3391_v29 = vmax.f32 %v3327_v5, 0.0  ;;  %v5024_v5 = vld [vmem:[#allocation22_spill] sm:$0xff] }
 0x2c1   :  { %v3390_v54 = vmax.f32 %v3326_v34, 0.0  ;;  %v3915_v33 = vpop.f32.mrb[76].mxu1 }
 0x2c2   :  { %3455 = vst [vmem:[#allocation11 + $0x158] sm:$0xff] %v3391_v29  ;;  %v2530_v2 = vadd.f32 %v3915_v33, %v4724_v42  ;;  %v2524_v60 = vpop.f32.mrb[77].mxu1 }
 0x2c3   :  { %3454 = vst [vmem:[#allocation11 + $0x150] sm:$0xff] %v3390_v54  ;;  %v2525_v53 = vadd.f32 %v2524_v60, %v4718_v57 }
 0x2c4   :  { %v3259_v4 = vmul.f32 %v4777_v26, %v2530_v2 }
 0x2c5   :  { %v3258_v43 = vmul.f32 %v4777_v26, %v2525_v53 }
 0x2c6   :  { %v3329_v52 = vadd.f32 %v4782_v51, %v3259_v4  ;;  %v5025_v4 = vld [vmem:[#allocation25_spill] sm:$0xff] }
 0x2c7   :  { %v3328_v18 = vadd.f32 %v4782_v51, %v3258_v43 }
 0x2c8   :  { %v3393_v3 = vmax.f32 %v3329_v52, 0.0 }
 0x2c9   :  { %v3392_v19 = vmax.f32 %v3328_v18, 0.0  ;;  %v3922_v16 = vpop.f32.mrb[78].mxu1 }
 0x2ca   :  { %3457 = vst [vmem:[#allocation11 + $0x168] sm:$0xff] %v3393_v3  ;;  %v2605_v7 = vadd.f32 %v3922_v16, %v4732_v32  ;;  %v2599_v62 = vpop.f32.mrb[79].mxu1  ;;  %v5026_v3 = vld [vmem:[#allocation24_spill] sm:$0xff] }
 0x2cb   :  { %3456 = vst [vmem:[#allocation11 + $0x160] sm:$0xff] %v3392_v19  ;;  %v2600_v42 = vadd.f32 %v2599_v62, %v4726_v47 }
 0x2cc   :  { %v3261_v57 = vmul.f32 %v4777_v26, %v2605_v7 }
 0x2cd   :  { %v3260_v30 = vmul.f32 %v4777_v26, %v2600_v42  ;;  %v3929_v36 = vpop.f32.mrb[80].mxu1 }
 0x2ce   :  { %v3331_v11 = vadd.f32 %v4782_v51, %v3261_v57  ;;  %v2680_v17 = vadd.f32 %v3929_v36, %v5017_v40  ;;  %v2674_v8 = vpop.f32.mrb[81].mxu1  ;;  %v5027_v36 = vld [vmem:[#allocation27_spill] sm:$0xff] }
 0x2cf   :  { %v3330_v37 = vadd.f32 %v4782_v51, %v3260_v30  ;;  %v2675_v49 = vadd.f32 %v2674_v8, %v5018_v23  ;;  %v5028_v8 = vld [vmem:[#allocation26_spill] sm:$0xff] }
 0x2d0   :  { %v3395_v31 = vmax.f32 %v3331_v11, 0.0  ;;  %v3263_v32 = vmul.f32 %v4777_v26, %v2680_v17 }
 0x2d1   :  { %v3394_v45 = vmax.f32 %v3330_v37, 0.0  ;;  %v3262_v47 = vmul.f32 %v4777_v26, %v2675_v49  ;;  %v3936_v39 = vpop.f32.mrb[82].mxu1 }
 0x2d2   :  { %3459 = vst [vmem:[#allocation11 + $0x178] sm:$0xff] %v3395_v31  ;;  %v3333_v61 = vadd.f32 %v4782_v51, %v3263_v32  ;;  %v2755_v27 = vadd.f32 %v3936_v39, %v5019_v10  ;;  %v2749_v48 = vpop.f32.mrb[83].mxu1  ;;  %v5029_v39 = vld [vmem:[#allocation29_spill] sm:$0xff] }
 0x2d3   :  { %3458 = vst [vmem:[#allocation11 + $0x170] sm:$0xff] %v3394_v45  ;;  %v3332_v24 = vadd.f32 %v4782_v51, %v3262_v47  ;;  %v2750_v28 = vadd.f32 %v2749_v48, %v5020_v21  ;;  %v5030_v48 = vld [vmem:[#allocation28_spill] sm:$0xff] }
 0x2d4   :  { %v3397_v59 = vmax.f32 %v3333_v61, 0.0  ;;  %v3265_v58 = vmul.f32 %v4777_v26, %v2755_v27 }
 0x2d5   :  { %v3396_v44 = vmax.f32 %v3332_v24, 0.0  ;;  %v3264_v35 = vmul.f32 %v4777_v26, %v2750_v28  ;;  %v3943_v25 = vpop.f32.mrb[84].mxu1 }
 0x2d6   :  { %3461 = vst [vmem:[#allocation11 + $0x188] sm:$0xff] %v3397_v59  ;;  %v3335_v14 = vadd.f32 %v4782_v51, %v3265_v58  ;;  %v2830_v55 = vadd.f32 %v3943_v25, %v5021_v12  ;;  %v2824_v50 = vpop.f32.mrb[85].mxu1  ;;  %v5031_v25 = vld [vmem:[#allocation31_spill] sm:$0xff] }
 0x2d7   :  { %3460 = vst [vmem:[#allocation11 + $0x180] sm:$0xff] %v3396_v44  ;;  %v3334_v0 = vadd.f32 %v4782_v51, %v3264_v35  ;;  %v2825_v9 = vadd.f32 %v2824_v50, %v5022_v38  ;;  %v5032_v50 = vld [vmem:[#allocation30_spill] sm:$0xff] }
 0x2d8   :  { %v3399_v13 = vmax.f32 %v3335_v14, 0.0  ;;  %v3267_v22 = vmul.f32 %v4777_v26, %v2830_v55 }
 0x2d9   :  { %v3398_v1 = vmax.f32 %v3334_v0, 0.0  ;;  %v3266_v15 = vmul.f32 %v4777_v26, %v2825_v9  ;;  %v3950_v41 = vpop.f32.mrb[86].mxu1 }
 0x2da   :  { %3463 = vst [vmem:[#allocation11 + $0x198] sm:$0xff] %v3399_v13  ;;  %v3337_v56 = vadd.f32 %v4782_v51, %v3267_v22  ;;  %v2905_v63 = vadd.f32 %v3950_v41, %v5023_v46  ;;  %v2899_v20 = vpop.f32.mrb[87].mxu1 }
 0x2db   :  { %3462 = vst [vmem:[#allocation11 + $0x190] sm:$0xff] %v3398_v1  ;;  %v3336_v6 = vadd.f32 %v4782_v51, %v3266_v15  ;;  %v2900_v34 = vadd.f32 %v2899_v20, %v5024_v5 }
 0x2dc   :  { %v3401_v29 = vmax.f32 %v3337_v56, 0.0  ;;  %v3269_v54 = vmul.f32 %v4777_v26, %v2905_v63 }
 0x2dd   :  { %v3400_v33 = vmax.f32 %v3336_v6, 0.0  ;;  %v3268_v2 = vmul.f32 %v4777_v26, %v2900_v34  ;;  %v3957_v60 = vpop.f32.mrb[88].mxu1 }
 0x2de   :  { %3465 = vst [vmem:[#allocation11 + $0x1a8] sm:$0xff] %v3401_v29  ;;  %v3339_v53 = vadd.f32 %v4782_v51, %v3269_v54  ;;  %v2980_v43 = vadd.f32 %v3957_v60, %v5025_v4  ;;  %v2974_v52 = vpop.f32.mrb[89].mxu1 }
 0x2df   :  { %3464 = vst [vmem:[#allocation11 + $0x1a0] sm:$0xff] %v3400_v33  ;;  %v3338_v18 = vadd.f32 %v4782_v51, %v3268_v2  ;;  %v2975_v19 = vadd.f32 %v2974_v52, %v5026_v3 }
 0x2e0   :  { %v3403_v16 = vmax.f32 %v3339_v53, 0.0  ;;  %v3271_v7 = vmul.f32 %v4777_v26, %v2980_v43 }
 0x2e1   :  { %v3402_v62 = vmax.f32 %v3338_v18, 0.0  ;;  %v3270_v42 = vmul.f32 %v4777_v26, %v2975_v19  ;;  %v3964_v57 = vpop.f32.mrb[90].mxu1 }
 0x2e2   :  { %3467 = vst [vmem:[#allocation11 + $0x1b8] sm:$0xff] %v3403_v16  ;;  %v3341_v30 = vadd.f32 %v4782_v51, %v3271_v7  ;;  %v3055_v11 = vadd.f32 %v3964_v57, %v5027_v36  ;;  %v3049_v40 = vpop.f32.mrb[91].mxu1 }
 0x2e3   :  { %3466 = vst [vmem:[#allocation11 + $0x1b0] sm:$0xff] %v3402_v62  ;;  %v3340_v17 = vadd.f32 %v4782_v51, %v3270_v42  ;;  %v3050_v37 = vadd.f32 %v3049_v40, %v5028_v8 }
 0x2e4   :  { %v3405_v23 = vmax.f32 %v3341_v30, 0.0  ;;  %v3273_v49 = vmul.f32 %v4777_v26, %v3055_v11 }
 0x2e5   :  { %v3404_v31 = vmax.f32 %v3340_v17, 0.0  ;;  %v3272_v32 = vmul.f32 %v4777_v26, %v3050_v37  ;;  %v3971_v45 = vpop.f32.mrb[92].mxu1 }
 0x2e6   :  { %3469 = vst [vmem:[#allocation11 + $0x1c8] sm:$0xff] %v3405_v23  ;;  %v3343_v47 = vadd.f32 %v4782_v51, %v3273_v49  ;;  %v3130_v61 = vadd.f32 %v3971_v45, %v5029_v39  ;;  %v3124_v10 = vpop.f32.mrb[93].mxu1 }
 0x2e7   :  { %3468 = vst [vmem:[#allocation11 + $0x1c0] sm:$0xff] %v3404_v31  ;;  %v3342_v27 = vadd.f32 %v4782_v51, %v3272_v32  ;;  %v3125_v24 = vadd.f32 %v3124_v10, %v5030_v48 }
 0x2e8   :  { %v3407_v21 = vmax.f32 %v3343_v47, 0.0  ;;  %v3275_v28 = vmul.f32 %v4777_v26, %v3130_v61 }
 0x2e9   :  { %v3406_v59 = vmax.f32 %v3342_v27, 0.0  ;;  %v3274_v58 = vmul.f32 %v4777_v26, %v3125_v24  ;;  %v3978_v44 = vpop.f32.mrb[94].mxu1 }
 0x2ea   :  { %3471 = vst [vmem:[#allocation11 + $0x1d8] sm:$0xff] %v3407_v21  ;;  %v3345_v35 = vadd.f32 %v4782_v51, %v3275_v28  ;;  %v3205_v14 = vadd.f32 %v3978_v44, %v5031_v25  ;;  %v3199_v12 = vpop.f32.mrb[95].mxu1 }
 0x2eb   :  { %3470 = vst [vmem:[#allocation11 + $0x1d0] sm:$0xff] %v3406_v59  ;;  %v3344_v55 = vadd.f32 %v4782_v51, %v3274_v58  ;;  %v3200_v0 = vadd.f32 %v3199_v12, %v5032_v50 }
 0x2ec   :  { %v3409_v38 = vmax.f32 %v3345_v35, 0.0  ;;  %v3277_v9 = vmul.f32 %v4777_v26, %v3205_v14 }
 0x2ed   :  { %v3408_v13 = vmax.f32 %v3344_v55, 0.0  ;;  %v3276_v22 = vmul.f32 %v4777_v26, %v3200_v0 }
 0x2ee   :  { %3473 = vst [vmem:[#allocation11 + $0x1e8] sm:$0xff] %v3409_v38  ;;  %v3347_v1 = vadd.f32 %v4782_v51, %v3277_v9 }
 0x2ef   :  { %3472 = vst [vmem:[#allocation11 + $0x1e0] sm:$0xff] %v3408_v13  ;;  %v3346_v15 = vadd.f32 %v4782_v51, %v3276_v22 }
 0x2f0   :  { %v3411_v41 = vmax.f32 %v3347_v1, 0.0 }
 0x2f1   :  { %v3410_v56 = vmax.f32 %v3346_v15, 0.0 }
 0x2f2   :  { %3475 = vst [vmem:[#allocation11 + $0x1f8] sm:$0xff] %v3411_v41 }
 0x2f3   :  { %3474 = vst [vmem:[#allocation11 + $0x1f0] sm:$0xff] %v3410_v56 }
 0x2f4   :  { %4240 = shalt.err (!%p4237_p2)
}
 0x2f5   :  { %s4241_s7 = scalar_lea.hbm %s5000_s5, 8192 }
 0x2f6   :  { %p4242_p3 = scmp.ne.s32.totalorder %s5000_s5, %s4241_s7  ;;  %p4245_p4 = scmp.lt.u32.totalorder %s4241_s7, %s5000_s5 }
 0x2f8   :  { %p4247_p5 = pnand %p4245_p4, %p4242_p3 }
 0x2fa   :  { %4250 = shalt.err (!%p4247_p5)
}
 0x2fb   :  { %3487 = dma.vmem_to_hbm [thread:$0]  %s3482_s28, 8192, %s5000_s5, [#allocation4], %s4262_s3, %s4262_s3, %s4263_s21  }
 0x2fc   :  { %4257 = dma.done.wait [#allocation4], 8192  }
 0x2fd   :  { %4258 = vsyncadd [#allocation4], 4294959104 }
 0x2fe   :  { %3491 = vsyncpa [#allocation3], 1 }
 0x2ff   :  { %3492 = vsyncpa [#allocation6], 1 }
 0x300   :  { %3493 = vsyncpa [#allocation9], 1 }
 0x301   :  { %3494 = vsyncpa [#allocation4], 1 }

</bundles_post_ra>
